<compile_context>
chip_gen: v7x
topology: tpu7x:2x2x1
jax: 0.10.0
libtpu: 0.0.40
codegen_flags: <defaults>
</compile_context>

<pallas_src>
import functools

import jax
import jax.numpy as jnp
from jax.experimental import pallas as pl
from jax.experimental.pallas import tpu as pltpu


# ------------------------------------------------------------------ helpers --

def _gelu_tanh(x):
    # tanh-form GELU (runs on the EUP transcendental slot).
    # TODO(synk): torch nn.GELU() defaults to exact erf; the tanh form deviates
    # by <~1e-3 in absolute value.
    c = 0.7978845608028654  # sqrt(2/pi)
    return 0.5 * x * (1.0 + jnp.tanh(c * (x + 0.044715 * (x * x * x))))


def _layernorm(x, gamma, beta, eps=1e-5):
    mean = jnp.mean(x, axis=-1, keepdims=True)
    var = jnp.mean((x - mean) ** 2, axis=-1, keepdims=True)
    return (x - mean) * jax.lax.rsqrt(var + eps) * gamma + beta


# ------------------------------------------------------------------- kernel --

def transformer_block_kernel(x_ref, w_ref, b_ref, ln_ref, o_ref, *, num_heads):
    """Full transformer block for one batch tile.

    x_ref:  (Nb, L, E)  f32 input tokens for this batch tile
    w_ref:  (5, E, E)   bf16 [Wq^T, Wk^T, Wv^T, Wo^T, W_fcn^T]
    b_ref:  (5, E)      f32  [bq, bk, bv, bo, b_fcn]
    ln_ref: (4, E)      f32  [gamma1, beta1, gamma2, beta2]
    o_ref:  (Nb, L, E)  f32 output
    """
    nb, L, E = x_ref.shape
    H = num_heads
    D = E // H
    M = nb * L
    scale = 1.0 / (D ** 0.5)

    # Flatten the batch tile into one (M, E) row slab for all dense matmuls.
    x = x_ref[...].reshape(M, E).astype(jnp.float32)
    x_mxu = x.astype(jnp.bfloat16)

    wq, wk, wv, wo, w1 = (w_ref[i] for i in range(5))   # bf16 (E, E)
    bq, bk, bv, bo, b1 = (b_ref[i] for i in range(5))   # f32  (E,)

    # QKV projections: one (M, E) x (E, E) MXU matmul each, f32 accumulation.
    q = jnp.dot(x_mxu, wq, preferred_element_type=jnp.float32) + bq
    k = jnp.dot(x_mxu, wk, preferred_element_type=jnp.float32) + bk
    v = jnp.dot(x_mxu, wv, preferred_element_type=jnp.float32) + bv

    q3 = (q * scale).reshape(nb, L, E)
    k3 = k.reshape(nb, L, E)
    v3 = v.reshape(nb, L, E)

    # Per-head attention, batched over the batch tile.  The output projection
    # is folded into the loop:
    #     concat_h(o_h) @ Wo  ==  sum_h  o_h @ Wo[h*D:(h+1)*D, :]
    # so head outputs never round-trip through a VMEM scratch.
    # TODO(synk): for long sequences, tile keys with an online-softmax (flash)
    # formulation instead of materializing the (L, L) scores per head.
    attn = jnp.zeros((M, E), jnp.float32)
    for h in range(H):
        sl = slice(h * D, (h + 1) * D)
        qh = q3[:, :, sl].astype(jnp.bfloat16)           # (nb, L, D)
        kh = k3[:, :, sl].astype(jnp.bfloat16)
        vh = v3[:, :, sl].astype(jnp.bfloat16)
        s = jnp.einsum("bld,bmd->blm", qh, kh,
                       preferred_element_type=jnp.float32)       # (nb, L, L)
        s = s - jnp.max(s, axis=-1, keepdims=True)
        p = jnp.exp(s)
        p = p * pl.reciprocal(jnp.sum(p, axis=-1, keepdims=True), approx=True)
        oh = jnp.einsum("blm,bmd->bld", p.astype(jnp.bfloat16), vh,
                        preferred_element_type=jnp.float32)      # (nb, L, D)
        attn = attn + jnp.dot(oh.reshape(M, D).astype(jnp.bfloat16), wo[sl, :],
                              preferred_element_type=jnp.float32)
    attn = attn + bo

    # Residual + LayerNorm1.
    x1 = _layernorm(attn + x, ln_ref[0], ln_ref[1])

    # FCN: Linear -> GELU -> Dropout.
    # TODO(synk): nn.Dropout() is implemented as eval-mode identity; training
    # mode would need pltpu.prng_seed / pltpu.prng_random_bits.
    h1 = jnp.dot(x1.astype(jnp.bfloat16), w1,
                 preferred_element_type=jnp.float32) + b1
    h1 = _gelu_tanh(h1)

    # Residual + LayerNorm2.
    out = _layernorm(h1 + x1, ln_ref[2], ln_ref[3])
    o_ref[...] = out.reshape(nb, L, E).astype(o_ref.dtype)


# ------------------------------------------------------------------ wrapper --

def _pick_batch_tile(n_batch, seq_len, embed_dim,
                     target_rows=256, vmem_budget_bytes=8 * 1024 * 1024):
    """Largest batch-tile (a divisor of N) whose f32 activation slabs fit the
    budget; stop growing once the row count reaches target_rows (MXU-full)."""
    best = 1
    for nb in range(1, n_batch + 1):
        if n_batch % nb:
            continue
        rows = nb * seq_len
        # x, q, k, v, attn, x1, h1 (+ headroom) row slabs + per-head scores.
        approx_bytes = 4 * (8 * rows * embed_dim + nb * seq_len * seq_len)
        if approx_bytes > vmem_budget_bytes:
            break
        best = nb
        if rows >= target_rows:
            break
    return best


def transformer_block(x_lne, params, num_heads):
    """x_lne: (L, N, E) float32, PyTorch (seq, batch, embed) layout."""
    L, N, E = x_lne.shape
    x_nle = jnp.transpose(x_lne, (1, 0, 2))                    # (N, L, E)

    nb = _pick_batch_tile(N, L, E)
    grid = (N // nb,)

    # bf16 weights: half the VMEM/HBM footprint and the bf16 MXU rate; biases
    # and LayerNorm affine params stay f32.
    w = jnp.stack([params["wq_t"], params["wk_t"], params["wv_t"],
                   params["wo_t"], params["w1_t"]]).astype(jnp.bfloat16)
    b = jnp.stack([params["bq"], params["bk"], params["bv"],
                   params["bo"], params["b1"]])                # (5, E) f32
    ln = jnp.stack([params["g1"], params["beta1"],
                    params["g2"], params["beta2"]])            # (4, E) f32

    kernel = functools.partial(transformer_block_kernel, num_heads=num_heads)

    out_nle = pl.pallas_call(
        kernel,
        out_shape=jax.ShapeDtypeStruct((N, L, E), x_nle.dtype),
        grid_spec=pltpu.PrefetchScalarGridSpec(
            num_scalar_prefetch=0,
            grid=grid,
            in_specs=[
                pl.BlockSpec((nb, L, E), lambda n: (n, 0, 0)),
                pl.BlockSpec((5, E, E), lambda n: (0, 0, 0)),
                pl.BlockSpec((5, E), lambda n: (0, 0)),
                pl.BlockSpec((4, E), lambda n: (0, 0)),
            ],
            out_specs=pl.BlockSpec((nb, L, E), lambda n: (n, 0, 0)),
        ),
        compiler_params=pltpu.CompilerParams(
            dimension_semantics=("parallel",),
            vmem_limit_bytes=64 * 1024 * 1024,
        ),
    )(x_nle, w, b, ln)

    return jnp.transpose(out_nle, (1, 0, 2))                   # back to (L, N, E)


# ---------------------------------------------------------- pure-JAX reference

def reference_block(x_lne, params, num_heads, *, mxu_dtype=jnp.float32):
    """Pure-JAX reference.  With mxu_dtype=jnp.bfloat16 it mirrors the kernel's
    bf16 matmul operands; with jnp.float32 it is the full-precision module."""
    L, N, E = x_lne.shape
    D = E // num_heads
    scale = 1.0 / (D ** 0.5)
    md = mxu_dtype
    x = jnp.transpose(x_lne, (1, 0, 2)).astype(jnp.float32)    # (N, L, E)

    def mm(a, w):
        return jnp.dot(a.astype(md), w.astype(md),
                       preferred_element_type=jnp.float32)

    q = mm(x, params["wq_t"]) + params["bq"]
    k = mm(x, params["wk_t"]) + params["bk"]
    v = mm(x, params["wv_t"]) + params["bv"]

    def split(t):
        return t.reshape(N, L, num_heads, D).transpose(0, 2, 1, 3)   # (N,H,L,D)

    qh = split(q * scale)
    kh, vh = split(k), split(v)
    s = jnp.einsum("nhld,nhmd->nhlm", qh.astype(md), kh.astype(md),
                   preferred_element_type=jnp.float32)
    p = jax.nn.softmax(s, axis=-1)
    o = jnp.einsum("nhlm,nhmd->nhld", p.astype(md), vh.astype(md),
                   preferred_element_type=jnp.float32)
    o = o.transpose(0, 2, 1, 3).reshape(N, L, E)

    attn = mm(o, params["wo_t"]) + params["bo"]
    x1 = _layernorm(attn + x, params["g1"], params["beta1"])
    h1 = _gelu_tanh(mm(x1, params["w1_t"]) + params["b1"])
    out = _layernorm(h1 + x1, params["g2"], params["beta2"])
    return jnp.transpose(out, (1, 0, 2))


# --------------------------------------------------------------------- main --

if __name__ == "__main__":
    L, N, E, H = 8, 2, 32, 4   # seq, batch, embed_dim, num_heads

    key = jax.random.PRNGKey(0)
    ks = jax.random.split(key, 12)
    std = 0.1
    params = {
        "wq_t": std * jax.random.normal(ks[0], (E, E), jnp.float32),
        "wk_t": std * jax.random.normal(ks[1], (E, E), jnp.float32),
        "wv_t": std * jax.random.normal(ks[2], (E, E), jnp.float32),
        "wo_t": std * jax.random.normal(ks[3], (E, E), jnp.float32),
        "w1_t": std * jax.random.normal(ks[4], (E, E), jnp.float32),
        "bq": 0.01 * jax.random.normal(ks[5], (E,), jnp.float32),
        "bk": 0.01 * jax.random.normal(ks[6], (E,), jnp.float32),
        "bv": 0.01 * jax.random.normal(ks[7], (E,), jnp.float32),
        "bo": 0.01 * jax.random.normal(ks[8], (E,), jnp.float32),
        "b1": 0.01 * jax.random.normal(ks[9], (E,), jnp.float32),
        "g1": jnp.ones((E,), jnp.float32),
        "beta1": jnp.zeros((E,), jnp.float32),
        "g2": jnp.ones((E,), jnp.float32),
        "beta2": jnp.zeros((E,), jnp.float32),
    }

    x = jax.random.normal(ks[10], (L, N, E), jnp.float32)

    out = jax.block_until_ready(transformer_block(x, params, H))
    assert out.shape == (L, N, E)

    ref_bf16 = reference_block(x, params, H, mxu_dtype=jnp.bfloat16)
    ref_f32 = reference_block(x, params, H, mxu_dtype=jnp.float32)

    err_bf16 = float(jnp.max(jnp.abs(out - ref_bf16)))
    err_f32 = float(jnp.max(jnp.abs(out - ref_f32)))
    assert jnp.allclose(out, ref_bf16, atol=2e-2, rtol=2e-2), (
        f"bf16-mirrored max abs err = {err_bf16}")
    assert jnp.allclose(out, ref_f32, atol=5e-2, rtol=5e-2), (
        f"f32-reference max abs err = {err_f32}")

    print("KERNEL_OK")
</pallas_src>

<mosaic_0001>
module attributes {stable_mosaic.version = 11 : i64} {
  func.func @transformer_block_kernel(%arg0: i32, %arg1: memref<2x8x32xf32, #tpu.memory_space<vmem>>, %arg2: memref<5x32x32xbf16, #tpu.memory_space<vmem>>, %arg3: memref<5x32xf32, #tpu.memory_space<vmem>>, %arg4: memref<4x32xf32, #tpu.memory_space<vmem>>, %arg5: memref<2x8x32xf32, #tpu.memory_space<vmem>>) attributes {dimension_semantics = [#tpu.dimension_semantics<parallel>], iteration_bounds = array<i64: 1>, scalar_prefetch = 0 : i64, scratch_operands = 0 : i64, tpu.core_type = #tpu.core_type<tc>, window_params = [{transform_indices = @transform_0, window_bounds = array<i64: 2, 8, 32>}, {pipeline_mode = #tpu.pipeline_mode<synchronous>, transform_indices = @transform_1, window_bounds = array<i64: 5, 32, 32>}, {pipeline_mode = #tpu.pipeline_mode<synchronous>, transform_indices = @transform_2, window_bounds = array<i64: 5, 32>}, {pipeline_mode = #tpu.pipeline_mode<synchronous>, transform_indices = @transform_3, window_bounds = array<i64: 4, 32>}, {transform_indices = @transform_4, window_bounds = array<i64: 2, 8, 32>}]} {
    %c0 = arith.constant 0 : index
    %c0_0 = arith.constant 0 : index
    %c0_1 = arith.constant 0 : index
    %0 = vector.load %arg1[%c0, %c0_0, %c0_1] : memref<2x8x32xf32, #tpu.memory_space<vmem>>, vector<2x8x32xf32>
    %1 = vector.shape_cast %0 : vector<2x8x32xf32> to vector<16x32xf32>
    %2 = arith.truncf %1 : vector<16x32xf32> to vector<16x32xbf16>
    %c0_2 = arith.constant 0 : index
    %c0_3 = arith.constant 0 : index
    %c0_4 = arith.constant 0 : index
    %3 = vector.load %arg2[%c0_2, %c0_3, %c0_4] : memref<5x32x32xbf16, #tpu.memory_space<vmem>>, vector<1x32x32xbf16>
    %4 = vector.shape_cast %3 : vector<1x32x32xbf16> to vector<32x32xbf16>
    %c1 = arith.constant 1 : index
    %c0_5 = arith.constant 0 : index
    %c0_6 = arith.constant 0 : index
    %5 = vector.load %arg2[%c1, %c0_5, %c0_6] : memref<5x32x32xbf16, #tpu.memory_space<vmem>>, vector<1x32x32xbf16>
    %6 = vector.shape_cast %5 : vector<1x32x32xbf16> to vector<32x32xbf16>
    %c2 = arith.constant 2 : index
    %c0_7 = arith.constant 0 : index
    %c0_8 = arith.constant 0 : index
    %7 = vector.load %arg2[%c2, %c0_7, %c0_8] : memref<5x32x32xbf16, #tpu.memory_space<vmem>>, vector<1x32x32xbf16>
    %8 = vector.shape_cast %7 : vector<1x32x32xbf16> to vector<32x32xbf16>
    %c3 = arith.constant 3 : index
    %c0_9 = arith.constant 0 : index
    %c0_10 = arith.constant 0 : index
    %9 = vector.load %arg2[%c3, %c0_9, %c0_10] : memref<5x32x32xbf16, #tpu.memory_space<vmem>>, vector<1x32x32xbf16>
    %10 = vector.shape_cast %9 : vector<1x32x32xbf16> to vector<32x32xbf16>
    %c4 = arith.constant 4 : index
    %c0_11 = arith.constant 0 : index
    %c0_12 = arith.constant 0 : index
    %11 = vector.load %arg2[%c4, %c0_11, %c0_12] : memref<5x32x32xbf16, #tpu.memory_space<vmem>>, vector<1x32x32xbf16>
    %12 = vector.shape_cast %11 : vector<1x32x32xbf16> to vector<32x32xbf16>
    %c0_13 = arith.constant 0 : index
    %c0_14 = arith.constant 0 : index
    %13 = vector.load %arg3[%c0_13, %c0_14] : memref<5x32xf32, #tpu.memory_space<vmem>>, vector<1x32xf32>
    %14 = vector.shape_cast %13 : vector<1x32xf32> to vector<32xf32>
    %c1_15 = arith.constant 1 : index
    %c0_16 = arith.constant 0 : index
    %15 = vector.load %arg3[%c1_15, %c0_16] : memref<5x32xf32, #tpu.memory_space<vmem>>, vector<1x32xf32>
    %16 = vector.shape_cast %15 : vector<1x32xf32> to vector<32xf32>
    %c2_17 = arith.constant 2 : index
    %c0_18 = arith.constant 0 : index
    %17 = vector.load %arg3[%c2_17, %c0_18] : memref<5x32xf32, #tpu.memory_space<vmem>>, vector<1x32xf32>
    %18 = vector.shape_cast %17 : vector<1x32xf32> to vector<32xf32>
    %c3_19 = arith.constant 3 : index
    %c0_20 = arith.constant 0 : index
    %19 = vector.load %arg3[%c3_19, %c0_20] : memref<5x32xf32, #tpu.memory_space<vmem>>, vector<1x32xf32>
    %20 = vector.shape_cast %19 : vector<1x32xf32> to vector<32xf32>
    %c4_21 = arith.constant 4 : index
    %c0_22 = arith.constant 0 : index
    %21 = vector.load %arg3[%c4_21, %c0_22] : memref<5x32xf32, #tpu.memory_space<vmem>>, vector<1x32xf32>
    %22 = vector.shape_cast %21 : vector<1x32xf32> to vector<32xf32>
    %cst = arith.constant dense<0.000000e+00> : vector<16x32xf32>
    %23 = tpu.matmul %2, %4, %cst {dimension_numbers = #tpu.dot_dimension_numbers<[1], [0], [0], [1], [0, 0, 1, 1], [], []>} : vector<16x32xbf16>, vector<32x32xbf16>, vector<16x32xf32> -> vector<16x32xf32>
    %24 = vector.shape_cast %14 : vector<32xf32> to vector<1x32xf32>
    %25 = vector.broadcast %24 : vector<1x32xf32> to vector<16x32xf32>
    %26 = arith.addf %23, %25 : vector<16x32xf32>
    %cst_23 = arith.constant dense<0.000000e+00> : vector<16x32xf32>
    %27 = tpu.matmul %2, %6, %cst_23 {dimension_numbers = #tpu.dot_dimension_numbers<[1], [0], [0], [1], [0, 0, 1, 1], [], []>} : vector<16x32xbf16>, vector<32x32xbf16>, vector<16x32xf32> -> vector<16x32xf32>
    %28 = vector.shape_cast %16 : vector<32xf32> to vector<1x32xf32>
    %29 = vector.broadcast %28 : vector<1x32xf32> to vector<16x32xf32>
    %30 = arith.addf %27, %29 : vector<16x32xf32>
    %cst_24 = arith.constant dense<0.000000e+00> : vector<16x32xf32>
    %31 = tpu.matmul %2, %8, %cst_24 {dimension_numbers = #tpu.dot_dimension_numbers<[1], [0], [0], [1], [0, 0, 1, 1], [], []>} : vector<16x32xbf16>, vector<32x32xbf16>, vector<16x32xf32> -> vector<16x32xf32>
    %32 = vector.shape_cast %18 : vector<32xf32> to vector<1x32xf32>
    %33 = vector.broadcast %32 : vector<1x32xf32> to vector<16x32xf32>
    %34 = arith.addf %31, %33 : vector<16x32xf32>
    %cst_25 = arith.constant 0.353553385 : f32
    %35 = vector.broadcast %cst_25 : f32 to vector<16x32xf32>
    %36 = arith.mulf %26, %35 : vector<16x32xf32>
    %37 = vector.shape_cast %36 : vector<16x32xf32> to vector<2x8x32xf32>
    %38 = vector.shape_cast %30 : vector<16x32xf32> to vector<2x8x32xf32>
    %39 = vector.shape_cast %34 : vector<16x32xf32> to vector<2x8x32xf32>
    %cst_26 = arith.constant 0.000000e+00 : f32
    %40 = vector.broadcast %cst_26 : f32 to vector<16x32xf32>
    %41 = vector.extract_strided_slice %37 {offsets = [0, 0, 0], sizes = [2, 8, 8], strides = [1, 1, 1]} : vector<2x8x32xf32> to vector<2x8x8xf32>
    %42 = arith.truncf %41 : vector<2x8x8xf32> to vector<2x8x8xbf16>
    %43 = vector.extract_strided_slice %38 {offsets = [0, 0, 0], sizes = [2, 8, 8], strides = [1, 1, 1]} : vector<2x8x32xf32> to vector<2x8x8xf32>
    %44 = arith.truncf %43 : vector<2x8x8xf32> to vector<2x8x8xbf16>
    %45 = vector.extract_strided_slice %39 {offsets = [0, 0, 0], sizes = [2, 8, 8], strides = [1, 1, 1]} : vector<2x8x32xf32> to vector<2x8x8xf32>
    %46 = arith.truncf %45 : vector<2x8x8xf32> to vector<2x8x8xbf16>
    "tpu.trace_start"() <{level = 10 : i32, message = "bld,bmd->blm"}> : () -> ()
    %cst_27 = arith.constant dense<0.000000e+00> : vector<2x8x8xf32>
    %47 = tpu.matmul %42, %44, %cst_27 {dimension_numbers = #tpu.dot_dimension_numbers<[2], [2], [1], [1], [0, 0, 0, 1, 1, 1], [0], [0]>} : vector<2x8x8xbf16>, vector<2x8x8xbf16>, vector<2x8x8xf32> -> vector<2x8x8xf32>
    "tpu.trace_stop"() : () -> ()
    %cst_28 = arith.constant dense<0xFF800000> : vector<2x8xf32>
    %48 = vector.multi_reduction <maximumf>, %47, %cst_28 [2] : vector<2x8x8xf32> to vector<2x8xf32>
    %49 = vector.shape_cast %48 : vector<2x8xf32> to vector<2x8x1xf32>
    %50 = vector.broadcast %49 : vector<2x8x1xf32> to vector<2x8x8xf32>
    %51 = arith.subf %47, %50 : vector<2x8x8xf32>
    %52 = math.exp %51 : vector<2x8x8xf32>
    %cst_29 = arith.constant dense<0.000000e+00> : vector<2x8xf32>
    %53 = vector.multi_reduction <add>, %52, %cst_29 [2] : vector<2x8x8xf32> to vector<2x8xf32>
    %54 = vector.shape_cast %53 : vector<2x8xf32> to vector<2x8x1xf32>
    %55 = tpu.reciprocal %54 {approx = true} : vector<2x8x1xf32> -> vector<2x8x1xf32>
    %56 = vector.broadcast %55 : vector<2x8x1xf32> to vector<2x8x8xf32>
    %57 = arith.mulf %52, %56 : vector<2x8x8xf32>
    %58 = arith.truncf %57 : vector<2x8x8xf32> to vector<2x8x8xbf16>
    "tpu.trace_start"() <{level = 10 : i32, message = "blm,bmd->bld"}> : () -> ()
    %cst_30 = arith.constant dense<0.000000e+00> : vector<2x8x8xf32>
    %59 = tpu.matmul %58, %46, %cst_30 {dimension_numbers = #tpu.dot_dimension_numbers<[2], [1], [1], [2], [0, 0, 0, 1, 1, 2], [0], [0]>} : vector<2x8x8xbf16>, vector<2x8x8xbf16>, vector<2x8x8xf32> -> vector<2x8x8xf32>
    "tpu.trace_stop"() : () -> ()
    %60 = vector.shape_cast %59 : vector<2x8x8xf32> to vector<16x8xf32>
    %61 = arith.truncf %60 : vector<16x8xf32> to vector<16x8xbf16>
    %62 = vector.extract_strided_slice %10 {offsets = [0, 0], sizes = [8, 32], strides = [1, 1]} : vector<32x32xbf16> to vector<8x32xbf16>
    %cst_31 = arith.constant dense<0.000000e+00> : vector<16x32xf32>
    %63 = tpu.matmul %61, %62, %cst_31 {dimension_numbers = #tpu.dot_dimension_numbers<[1], [0], [0], [1], [0, 0, 1, 1], [], []>} : vector<16x8xbf16>, vector<8x32xbf16>, vector<16x32xf32> -> vector<16x32xf32>
    %64 = arith.addf %40, %63 : vector<16x32xf32>
    %65 = vector.extract_strided_slice %37 {offsets = [0, 0, 8], sizes = [2, 8, 8], strides = [1, 1, 1]} : vector<2x8x32xf32> to vector<2x8x8xf32>
    %66 = arith.truncf %65 : vector<2x8x8xf32> to vector<2x8x8xbf16>
    %67 = vector.extract_strided_slice %38 {offsets = [0, 0, 8], sizes = [2, 8, 8], strides = [1, 1, 1]} : vector<2x8x32xf32> to vector<2x8x8xf32>
    %68 = arith.truncf %67 : vector<2x8x8xf32> to vector<2x8x8xbf16>
    %69 = vector.extract_strided_slice %39 {offsets = [0, 0, 8], sizes = [2, 8, 8], strides = [1, 1, 1]} : vector<2x8x32xf32> to vector<2x8x8xf32>
    %70 = arith.truncf %69 : vector<2x8x8xf32> to vector<2x8x8xbf16>
    "tpu.trace_start"() <{level = 10 : i32, message = "bld,bmd->blm"}> : () -> ()
    %cst_32 = arith.constant dense<0.000000e+00> : vector<2x8x8xf32>
    %71 = tpu.matmul %66, %68, %cst_32 {dimension_numbers = #tpu.dot_dimension_numbers<[2], [2], [1], [1], [0, 0, 0, 1, 1, 1], [0], [0]>} : vector<2x8x8xbf16>, vector<2x8x8xbf16>, vector<2x8x8xf32> -> vector<2x8x8xf32>
    "tpu.trace_stop"() : () -> ()
    %cst_33 = arith.constant dense<0xFF800000> : vector<2x8xf32>
    %72 = vector.multi_reduction <maximumf>, %71, %cst_33 [2] : vector<2x8x8xf32> to vector<2x8xf32>
    %73 = vector.shape_cast %72 : vector<2x8xf32> to vector<2x8x1xf32>
    %74 = vector.broadcast %73 : vector<2x8x1xf32> to vector<2x8x8xf32>
    %75 = arith.subf %71, %74 : vector<2x8x8xf32>
    %76 = math.exp %75 : vector<2x8x8xf32>
    %cst_34 = arith.constant dense<0.000000e+00> : vector<2x8xf32>
    %77 = vector.multi_reduction <add>, %76, %cst_34 [2] : vector<2x8x8xf32> to vector<2x8xf32>
    %78 = vector.shape_cast %77 : vector<2x8xf32> to vector<2x8x1xf32>
    %79 = tpu.reciprocal %78 {approx = true} : vector<2x8x1xf32> -> vector<2x8x1xf32>
    %80 = vector.broadcast %79 : vector<2x8x1xf32> to vector<2x8x8xf32>
    %81 = arith.mulf %76, %80 : vector<2x8x8xf32>
    %82 = arith.truncf %81 : vector<2x8x8xf32> to vector<2x8x8xbf16>
    "tpu.trace_start"() <{level = 10 : i32, message = "blm,bmd->bld"}> : () -> ()
    %cst_35 = arith.constant dense<0.000000e+00> : vector<2x8x8xf32>
    %83 = tpu.matmul %82, %70, %cst_35 {dimension_numbers = #tpu.dot_dimension_numbers<[2], [1], [1], [2], [0, 0, 0, 1, 1, 2], [0], [0]>} : vector<2x8x8xbf16>, vector<2x8x8xbf16>, vector<2x8x8xf32> -> vector<2x8x8xf32>
    "tpu.trace_stop"() : () -> ()
    %84 = vector.shape_cast %83 : vector<2x8x8xf32> to vector<16x8xf32>
    %85 = arith.truncf %84 : vector<16x8xf32> to vector<16x8xbf16>
    %86 = vector.extract_strided_slice %10 {offsets = [8, 0], sizes = [8, 32], strides = [1, 1]} : vector<32x32xbf16> to vector<8x32xbf16>
    %cst_36 = arith.constant dense<0.000000e+00> : vector<16x32xf32>
    %87 = tpu.matmul %85, %86, %cst_36 {dimension_numbers = #tpu.dot_dimension_numbers<[1], [0], [0], [1], [0, 0, 1, 1], [], []>} : vector<16x8xbf16>, vector<8x32xbf16>, vector<16x32xf32> -> vector<16x32xf32>
    %88 = arith.addf %64, %87 : vector<16x32xf32>
    %89 = vector.extract_strided_slice %37 {offsets = [0, 0, 16], sizes = [2, 8, 8], strides = [1, 1, 1]} : vector<2x8x32xf32> to vector<2x8x8xf32>
    %90 = arith.truncf %89 : vector<2x8x8xf32> to vector<2x8x8xbf16>
    %91 = vector.extract_strided_slice %38 {offsets = [0, 0, 16], sizes = [2, 8, 8], strides = [1, 1, 1]} : vector<2x8x32xf32> to vector<2x8x8xf32>
    %92 = arith.truncf %91 : vector<2x8x8xf32> to vector<2x8x8xbf16>
    %93 = vector.extract_strided_slice %39 {offsets = [0, 0, 16], sizes = [2, 8, 8], strides = [1, 1, 1]} : vector<2x8x32xf32> to vector<2x8x8xf32>
    %94 = arith.truncf %93 : vector<2x8x8xf32> to vector<2x8x8xbf16>
    "tpu.trace_start"() <{level = 10 : i32, message = "bld,bmd->blm"}> : () -> ()
    %cst_37 = arith.constant dense<0.000000e+00> : vector<2x8x8xf32>
    %95 = tpu.matmul %90, %92, %cst_37 {dimension_numbers = #tpu.dot_dimension_numbers<[2], [2], [1], [1], [0, 0, 0, 1, 1, 1], [0], [0]>} : vector<2x8x8xbf16>, vector<2x8x8xbf16>, vector<2x8x8xf32> -> vector<2x8x8xf32>
    "tpu.trace_stop"() : () -> ()
    %cst_38 = arith.constant dense<0xFF800000> : vector<2x8xf32>
    %96 = vector.multi_reduction <maximumf>, %95, %cst_38 [2] : vector<2x8x8xf32> to vector<2x8xf32>
    %97 = vector.shape_cast %96 : vector<2x8xf32> to vector<2x8x1xf32>
    %98 = vector.broadcast %97 : vector<2x8x1xf32> to vector<2x8x8xf32>
    %99 = arith.subf %95, %98 : vector<2x8x8xf32>
    %100 = math.exp %99 : vector<2x8x8xf32>
    %cst_39 = arith.constant dense<0.000000e+00> : vector<2x8xf32>
    %101 = vector.multi_reduction <add>, %100, %cst_39 [2] : vector<2x8x8xf32> to vector<2x8xf32>
    %102 = vector.shape_cast %101 : vector<2x8xf32> to vector<2x8x1xf32>
    %103 = tpu.reciprocal %102 {approx = true} : vector<2x8x1xf32> -> vector<2x8x1xf32>
    %104 = vector.broadcast %103 : vector<2x8x1xf32> to vector<2x8x8xf32>
    %105 = arith.mulf %100, %104 : vector<2x8x8xf32>
    %106 = arith.truncf %105 : vector<2x8x8xf32> to vector<2x8x8xbf16>
    "tpu.trace_start"() <{level = 10 : i32, message = "blm,bmd->bld"}> : () -> ()
    %cst_40 = arith.constant dense<0.000000e+00> : vector<2x8x8xf32>
    %107 = tpu.matmul %106, %94, %cst_40 {dimension_numbers = #tpu.dot_dimension_numbers<[2], [1], [1], [2], [0, 0, 0, 1, 1, 2], [0], [0]>} : vector<2x8x8xbf16>, vector<2x8x8xbf16>, vector<2x8x8xf32> -> vector<2x8x8xf32>
    "tpu.trace_stop"() : () -> ()
    %108 = vector.shape_cast %107 : vector<2x8x8xf32> to vector<16x8xf32>
    %109 = arith.truncf %108 : vector<16x8xf32> to vector<16x8xbf16>
    %110 = vector.extract_strided_slice %10 {offsets = [16, 0], sizes = [8, 32], strides = [1, 1]} : vector<32x32xbf16> to vector<8x32xbf16>
    %cst_41 = arith.constant dense<0.000000e+00> : vector<16x32xf32>
    %111 = tpu.matmul %109, %110, %cst_41 {dimension_numbers = #tpu.dot_dimension_numbers<[1], [0], [0], [1], [0, 0, 1, 1], [], []>} : vector<16x8xbf16>, vector<8x32xbf16>, vector<16x32xf32> -> vector<16x32xf32>
    %112 = arith.addf %88, %111 : vector<16x32xf32>
    %113 = vector.extract_strided_slice %37 {offsets = [0, 0, 24], sizes = [2, 8, 8], strides = [1, 1, 1]} : vector<2x8x32xf32> to vector<2x8x8xf32>
    %114 = arith.truncf %113 : vector<2x8x8xf32> to vector<2x8x8xbf16>
    %115 = vector.extract_strided_slice %38 {offsets = [0, 0, 24], sizes = [2, 8, 8], strides = [1, 1, 1]} : vector<2x8x32xf32> to vector<2x8x8xf32>
    %116 = arith.truncf %115 : vector<2x8x8xf32> to vector<2x8x8xbf16>
    %117 = vector.extract_strided_slice %39 {offsets = [0, 0, 24], sizes = [2, 8, 8], strides = [1, 1, 1]} : vector<2x8x32xf32> to vector<2x8x8xf32>
    %118 = arith.truncf %117 : vector<2x8x8xf32> to vector<2x8x8xbf16>
    "tpu.trace_start"() <{level = 10 : i32, message = "bld,bmd->blm"}> : () -> ()
    %cst_42 = arith.constant dense<0.000000e+00> : vector<2x8x8xf32>
    %119 = tpu.matmul %114, %116, %cst_42 {dimension_numbers = #tpu.dot_dimension_numbers<[2], [2], [1], [1], [0, 0, 0, 1, 1, 1], [0], [0]>} : vector<2x8x8xbf16>, vector<2x8x8xbf16>, vector<2x8x8xf32> -> vector<2x8x8xf32>
    "tpu.trace_stop"() : () -> ()
    %cst_43 = arith.constant dense<0xFF800000> : vector<2x8xf32>
    %120 = vector.multi_reduction <maximumf>, %119, %cst_43 [2] : vector<2x8x8xf32> to vector<2x8xf32>
    %121 = vector.shape_cast %120 : vector<2x8xf32> to vector<2x8x1xf32>
    %122 = vector.broadcast %121 : vector<2x8x1xf32> to vector<2x8x8xf32>
    %123 = arith.subf %119, %122 : vector<2x8x8xf32>
    %124 = math.exp %123 : vector<2x8x8xf32>
    %cst_44 = arith.constant dense<0.000000e+00> : vector<2x8xf32>
    %125 = vector.multi_reduction <add>, %124, %cst_44 [2] : vector<2x8x8xf32> to vector<2x8xf32>
    %126 = vector.shape_cast %125 : vector<2x8xf32> to vector<2x8x1xf32>
    %127 = tpu.reciprocal %126 {approx = true} : vector<2x8x1xf32> -> vector<2x8x1xf32>
    %128 = vector.broadcast %127 : vector<2x8x1xf32> to vector<2x8x8xf32>
    %129 = arith.mulf %124, %128 : vector<2x8x8xf32>
    %130 = arith.truncf %129 : vector<2x8x8xf32> to vector<2x8x8xbf16>
    "tpu.trace_start"() <{level = 10 : i32, message = "blm,bmd->bld"}> : () -> ()
    %cst_45 = arith.constant dense<0.000000e+00> : vector<2x8x8xf32>
    %131 = tpu.matmul %130, %118, %cst_45 {dimension_numbers = #tpu.dot_dimension_numbers<[2], [1], [1], [2], [0, 0, 0, 1, 1, 2], [0], [0]>} : vector<2x8x8xbf16>, vector<2x8x8xbf16>, vector<2x8x8xf32> -> vector<2x8x8xf32>
    "tpu.trace_stop"() : () -> ()
    %132 = vector.shape_cast %131 : vector<2x8x8xf32> to vector<16x8xf32>
    %133 = arith.truncf %132 : vector<16x8xf32> to vector<16x8xbf16>
    %134 = vector.extract_strided_slice %10 {offsets = [24, 0], sizes = [8, 32], strides = [1, 1]} : vector<32x32xbf16> to vector<8x32xbf16>
    %cst_46 = arith.constant dense<0.000000e+00> : vector<16x32xf32>
    %135 = tpu.matmul %133, %134, %cst_46 {dimension_numbers = #tpu.dot_dimension_numbers<[1], [0], [0], [1], [0, 0, 1, 1], [], []>} : vector<16x8xbf16>, vector<8x32xbf16>, vector<16x32xf32> -> vector<16x32xf32>
    %136 = arith.addf %112, %135 : vector<16x32xf32>
    %137 = vector.shape_cast %20 : vector<32xf32> to vector<1x32xf32>
    %138 = vector.broadcast %137 : vector<1x32xf32> to vector<16x32xf32>
    %139 = arith.addf %136, %138 : vector<16x32xf32>
    %140 = arith.addf %139, %1 : vector<16x32xf32>
    %c0_47 = arith.constant 0 : index
    %c0_48 = arith.constant 0 : index
    %141 = vector.load %arg4[%c0_47, %c0_48] : memref<4x32xf32, #tpu.memory_space<vmem>>, vector<1x32xf32>
    %142 = vector.shape_cast %141 : vector<1x32xf32> to vector<32xf32>
    %c1_49 = arith.constant 1 : index
    %c0_50 = arith.constant 0 : index
    %143 = vector.load %arg4[%c1_49, %c0_50] : memref<4x32xf32, #tpu.memory_space<vmem>>, vector<1x32xf32>
    %144 = vector.shape_cast %143 : vector<1x32xf32> to vector<32xf32>
    %cst_51 = arith.constant dense<0.000000e+00> : vector<16xf32>
    %145 = vector.multi_reduction <add>, %140, %cst_51 [1] : vector<16x32xf32> to vector<16xf32>
    %146 = vector.shape_cast %145 : vector<16xf32> to vector<16x1xf32>
    %cst_52 = arith.constant 3.200000e+01 : f32
    %147 = vector.broadcast %cst_52 : f32 to vector<16x1xf32>
    %148 = arith.divf %146, %147 : vector<16x1xf32>
    %149 = vector.broadcast %148 : vector<16x1xf32> to vector<16x32xf32>
    %150 = arith.subf %140, %149 : vector<16x32xf32>
    %151 = arith.mulf %150, %150 : vector<16x32xf32>
    %cst_53 = arith.constant dense<0.000000e+00> : vector<16xf32>
    %152 = vector.multi_reduction <add>, %151, %cst_53 [1] : vector<16x32xf32> to vector<16xf32>
    %153 = vector.shape_cast %152 : vector<16xf32> to vector<16x1xf32>
    %cst_54 = arith.constant 3.200000e+01 : f32
    %154 = vector.broadcast %cst_54 : f32 to vector<16x1xf32>
    %155 = arith.divf %153, %154 : vector<16x1xf32>
    %156 = vector.broadcast %148 : vector<16x1xf32> to vector<16x32xf32>
    %157 = arith.subf %140, %156 : vector<16x32xf32>
    %cst_55 = arith.constant 9.99999974E-6 : f32
    %158 = vector.broadcast %cst_55 : f32 to vector<16x1xf32>
    %159 = arith.addf %155, %158 : vector<16x1xf32>
    %160 = math.rsqrt %159 : vector<16x1xf32>
    %161 = vector.broadcast %160 : vector<16x1xf32> to vector<16x32xf32>
    %162 = arith.mulf %157, %161 : vector<16x32xf32>
    %163 = vector.shape_cast %142 : vector<32xf32> to vector<1x32xf32>
    %164 = vector.broadcast %163 : vector<1x32xf32> to vector<16x32xf32>
    %165 = arith.mulf %162, %164 : vector<16x32xf32>
    %166 = vector.shape_cast %144 : vector<32xf32> to vector<1x32xf32>
    %167 = vector.broadcast %166 : vector<1x32xf32> to vector<16x32xf32>
    %168 = arith.addf %165, %167 : vector<16x32xf32>
    %169 = arith.truncf %168 : vector<16x32xf32> to vector<16x32xbf16>
    %cst_56 = arith.constant dense<0.000000e+00> : vector<16x32xf32>
    %170 = tpu.matmul %169, %12, %cst_56 {dimension_numbers = #tpu.dot_dimension_numbers<[1], [0], [0], [1], [0, 0, 1, 1], [], []>} : vector<16x32xbf16>, vector<32x32xbf16>, vector<16x32xf32> -> vector<16x32xf32>
    %171 = vector.shape_cast %22 : vector<32xf32> to vector<1x32xf32>
    %172 = vector.broadcast %171 : vector<1x32xf32> to vector<16x32xf32>
    %173 = arith.addf %170, %172 : vector<16x32xf32>
    %cst_57 = arith.constant 5.000000e-01 : f32
    %174 = vector.broadcast %cst_57 : f32 to vector<16x32xf32>
    %175 = arith.mulf %174, %173 : vector<16x32xf32>
    %176 = arith.mulf %173, %173 : vector<16x32xf32>
    %177 = arith.mulf %176, %173 : vector<16x32xf32>
    %cst_58 = arith.constant 4.471500e-02 : f32
    %178 = vector.broadcast %cst_58 : f32 to vector<16x32xf32>
    %179 = arith.mulf %178, %177 : vector<16x32xf32>
    %180 = arith.addf %173, %179 : vector<16x32xf32>
    %cst_59 = arith.constant 0.797884583 : f32
    %181 = vector.broadcast %cst_59 : f32 to vector<16x32xf32>
    %182 = arith.mulf %181, %180 : vector<16x32xf32>
    %183 = math.tanh %182 : vector<16x32xf32>
    %cst_60 = arith.constant 1.000000e+00 : f32
    %184 = vector.broadcast %cst_60 : f32 to vector<16x32xf32>
    %185 = arith.addf %184, %183 : vector<16x32xf32>
    %186 = arith.mulf %175, %185 : vector<16x32xf32>
    %187 = arith.addf %186, %168 : vector<16x32xf32>
    %c2_61 = arith.constant 2 : index
    %c0_62 = arith.constant 0 : index
    %188 = vector.load %arg4[%c2_61, %c0_62] : memref<4x32xf32, #tpu.memory_space<vmem>>, vector<1x32xf32>
    %189 = vector.shape_cast %188 : vector<1x32xf32> to vector<32xf32>
    %c3_63 = arith.constant 3 : index
    %c0_64 = arith.constant 0 : index
    %190 = vector.load %arg4[%c3_63, %c0_64] : memref<4x32xf32, #tpu.memory_space<vmem>>, vector<1x32xf32>
    %191 = vector.shape_cast %190 : vector<1x32xf32> to vector<32xf32>
    %cst_65 = arith.constant dense<0.000000e+00> : vector<16xf32>
    %192 = vector.multi_reduction <add>, %187, %cst_65 [1] : vector<16x32xf32> to vector<16xf32>
    %193 = vector.shape_cast %192 : vector<16xf32> to vector<16x1xf32>
    %cst_66 = arith.constant 3.200000e+01 : f32
    %194 = vector.broadcast %cst_66 : f32 to vector<16x1xf32>
    %195 = arith.divf %193, %194 : vector<16x1xf32>
    %196 = vector.broadcast %195 : vector<16x1xf32> to vector<16x32xf32>
    %197 = arith.subf %187, %196 : vector<16x32xf32>
    %198 = arith.mulf %197, %197 : vector<16x32xf32>
    %cst_67 = arith.constant dense<0.000000e+00> : vector<16xf32>
    %199 = vector.multi_reduction <add>, %198, %cst_67 [1] : vector<16x32xf32> to vector<16xf32>
    %200 = vector.shape_cast %199 : vector<16xf32> to vector<16x1xf32>
    %cst_68 = arith.constant 3.200000e+01 : f32
    %201 = vector.broadcast %cst_68 : f32 to vector<16x1xf32>
    %202 = arith.divf %200, %201 : vector<16x1xf32>
    %203 = vector.broadcast %195 : vector<16x1xf32> to vector<16x32xf32>
    %204 = arith.subf %187, %203 : vector<16x32xf32>
    %cst_69 = arith.constant 9.99999974E-6 : f32
    %205 = vector.broadcast %cst_69 : f32 to vector<16x1xf32>
    %206 = arith.addf %202, %205 : vector<16x1xf32>
    %207 = math.rsqrt %206 : vector<16x1xf32>
    %208 = vector.broadcast %207 : vector<16x1xf32> to vector<16x32xf32>
    %209 = arith.mulf %204, %208 : vector<16x32xf32>
    %210 = vector.shape_cast %189 : vector<32xf32> to vector<1x32xf32>
    %211 = vector.broadcast %210 : vector<1x32xf32> to vector<16x32xf32>
    %212 = arith.mulf %209, %211 : vector<16x32xf32>
    %213 = vector.shape_cast %191 : vector<32xf32> to vector<1x32xf32>
    %214 = vector.broadcast %213 : vector<1x32xf32> to vector<16x32xf32>
    %215 = arith.addf %212, %214 : vector<16x32xf32>
    %216 = vector.shape_cast %215 : vector<16x32xf32> to vector<2x8x32xf32>
    %c0_70 = arith.constant 0 : index
    %c0_71 = arith.constant 0 : index
    %c0_72 = arith.constant 0 : index
    %217 = vector.load %arg5[%c0_70, %c0_71, %c0_72] : memref<2x8x32xf32, #tpu.memory_space<vmem>>, vector<2x8x32xf32>
    tpu.vector_store %arg5[%c0_70, %c0_71, %c0_72], %216 {strides = array<i32>} : memref<2x8x32xf32, #tpu.memory_space<vmem>>, vector<2x8x32xf32>,
    return
  }
  func.func @transform_0(%arg0: i32) -> (i32, i32, i32) {
    %c0_i32 = arith.constant 0 : i32
    %c0_i32_0 = arith.constant 0 : i32
    %c0_i32_1 = arith.constant 0 : i32
    return %arg0, %c0_i32, %c0_i32_0 : i32, i32, i32
  }
  func.func @transform_1(%arg0: i32) -> (i32, i32, i32) {
    %c0_i32 = arith.constant 0 : i32
    %c0_i32_0 = arith.constant 0 : i32
    %c0_i32_1 = arith.constant 0 : i32
    %c0_i32_2 = arith.constant 0 : i32
    return %c0_i32, %c0_i32_0, %c0_i32_1 : i32, i32, i32
  }
  func.func @transform_2(%arg0: i32) -> (i32, i32) {
    %c0_i32 = arith.constant 0 : i32
    %c0_i32_0 = arith.constant 0 : i32
    %c0_i32_1 = arith.constant 0 : i32
    return %c0_i32, %c0_i32_0 : i32, i32
  }
  func.func @transform_3(%arg0: i32) -> (i32, i32) {
    %c0_i32 = arith.constant 0 : i32
    %c0_i32_0 = arith.constant 0 : i32
    %c0_i32_1 = arith.constant 0 : i32
    return %c0_i32, %c0_i32_0 : i32, i32
  }
  func.func @transform_4(%arg0: i32) -> (i32, i32, i32) {
    %c0_i32 = arith.constant 0 : i32
    %c0_i32_0 = arith.constant 0 : i32
    %c0_i32_1 = arith.constant 0 : i32
    return %arg0, %c0_i32, %c0_i32_0 : i32, i32, i32
  }
}

</mosaic_0001>

<bundles_post_ra>
// kernel: tpu_custom_call.1
= control target key start
LH: loop header
LB: loop body
LE: loop exit
PB: predicated region body
PF: predicated region fallthrough
CT: control target
= control target key end

     0   :  { %9 = vsyncpa [#allocation3], 0  ;;  %s2305_s0 = inlined_call_operand.hbm [shape: f32[2,8,32], index: 0, kind: input, shape index: {}]   ;;  %s2306_s1 = inlined_call_operand.hbm [shape: bf16[5,32,32], index: 1, kind: input, shape index: {}]   ;;  %s2307_s2 = inlined_call_operand.hbm [shape: f32[5,32], index: 2, kind: input, shape index: {}]   ;;  %s2308_s3 = inlined_call_operand.hbm [shape: f32[4,32], index: 3, kind: input, shape index: {}]   ;;  %s2309_s4 = inlined_call_operand.hbm [shape: f32[2,8,32], index: 4, kind: output, shape index: {}]  }
   0x1   :  { %10 = vsyncpa [#allocation6], 0 }
   0x2   :  { %11 = vsyncpa [#allocation9], 0 }
   0x3   :  { %12 = vsyncpa [#allocation4], 0  ;;  %s1977_s15 = smov [#allocation5]   ;;  %s1859_s19 = scalar_lea.hbm %s2306_s1, 1280 }
   0x4   :  { %s30_s16 = sshll.u32 %s1977_s15, 4  ;;  %p1860_p0 = scmp.ne.s32.totalorder %s2306_s1, %s1859_s19  ;;  %s31_s16 = int_to_ptr.vmem [resolvable:$true] %s30_s16 }
   0x5   :  { %p1863_p1 = scmp.lt.u32.totalorder %s1859_s19, %s2306_s1 }
   0x7   :  { %p1865_p2 = pnand %p1863_p1, %p1860_p0 }
   0x9   :  { %1868 = shalt.err (!%p1865_p2)
}
   0xa   :  { %s1869_s24 = scalar_lea.vmem %s31_s16, 1280  ;;  %p1874_p4 = scmp.lt.s32.totalorder %s31_s16, %s31_s16 }
   0xb   :  { %p1870_p3 = scmp.ne.s32.totalorder %s31_s16, %s1869_s24  ;;  %p1875_p5 = scmp.lt.s32.totalorder %s1869_s24, %s1869_s24 }
   0xd   :  { %p1876_p6 = por %p1875_p5, %p1874_p4 }
   0xf   :  { %p1877_p7 = pnand %p1876_p6, %p1870_p3 }
  0x11   :  { %1880 = shalt.err (!%p1877_p7)
}
  0x12   :  { %s1978_s25 = smov 64   ;;  %s1979_s26 = smov 4  }
  0x13   :  { %36 = dma.hbm_to_vmem [thread:$0]  %s2306_s1, 1280, %s31_s16, [#allocation6], %s1978_s25, %s1978_s25, %s1979_s26  }
  0x14   :  { %s1980_s29 = smov [#allocation2]   ;;  %s1881_s7 = scalar_lea.hbm %s2305_s0, 256 }
  0x15   :  { %s18_s30 = sshll.u32 %s1980_s29, 4  ;;  %p1882_p8 = scmp.ne.s32.totalorder %s2305_s0, %s1881_s7  ;;  %s19_s30 = int_to_ptr.vmem [resolvable:$true] %s18_s30 }
  0x16   :  { %p1885_p9 = scmp.lt.u32.totalorder %s1881_s7, %s2305_s0 }
  0x18   :  { %p1887_p10 = pnand %p1885_p9, %p1882_p8 }
  0x1a   :  { %1890 = shalt.err (!%p1887_p10)
}
  0x1b   :  { %s1891_s12 = scalar_lea.vmem %s19_s30, 256  ;;  %p1896_p12 = scmp.lt.s32.totalorder %s19_s30, %s19_s30 }
  0x1c   :  { %p1892_p11 = scmp.ne.s32.totalorder %s19_s30, %s1891_s12  ;;  %p1897_p13 = scmp.lt.s32.totalorder %s1891_s12, %s1891_s12 }
  0x1e   :  { %p1898_p0 = por %p1897_p13, %p1896_p12 }
  0x20   :  { %p1899_p1 = pnand %p1898_p0, %p1892_p11 }
  0x22   :  { %1902 = shalt.err (!%p1899_p1)
}
  0x23   :  { %s1981_s1 = smov 128   ;;  %s1982_s13 = smov 8  }
  0x24   :  { %24 = dma.hbm_to_vmem [thread:$0]  %s2305_s0, 256, %s19_s30, [#allocation3], %s1981_s1, %s1981_s1, %s1982_s13  }
  0x25   :  { %s1983_s16 = smov [#allocation7]   ;;  %s1984_s18 = smov [#allocation8]  }
  0x26   :  { %s43_s17 = sshll.u32 %s1983_s16, 4  ;;  %s53_s19 = sshll.u32 %s1984_s18, 4  ;;  %s44_s17 = int_to_ptr.vmem [resolvable:$true] %s43_s17  ;;  %s54_s19 = int_to_ptr.vmem [resolvable:$true] %s53_s19 }
  0x27   :  { %s1903_s22 = scalar_lea.hbm %s2307_s2, 128 }
  0x28   :  { %p1904_p2 = scmp.ne.s32.totalorder %s2307_s2, %s1903_s22  ;;  %p1907_p3 = scmp.lt.u32.totalorder %s1903_s22, %s2307_s2 }
  0x2a   :  { %p1909_p4 = pnand %p1907_p3, %p1904_p2 }
  0x2c   :  { %1912 = shalt.err (!%p1909_p4)
}
  0x2d   :  { %s1913_s0 = scalar_lea.vmem %s44_s17, 128  ;;  %p1918_p6 = scmp.lt.s32.totalorder %s44_s17, %s44_s17 }
  0x2e   :  { %p1914_p5 = scmp.ne.s32.totalorder %s44_s17, %s1913_s0  ;;  %p1919_p7 = scmp.lt.s32.totalorder %s1913_s0, %s1913_s0 }
  0x30   :  { %p1920_p8 = por %p1919_p7, %p1918_p6 }
  0x32   :  { %p1921_p9 = pnand %p1920_p8, %p1914_p5 }
  0x34   :  { %1924 = shalt.err (!%p1921_p9)
}
  0x35   :  { %46 = dma.hbm_to_vmem [thread:$0]  %s2307_s2, 128, %s44_s17, [#allocation6]  }
  0x36   :  { %s1925_s5 = scalar_lea.hbm %s2308_s3, 64 }
  0x37   :  { %p1926_p10 = scmp.ne.s32.totalorder %s2308_s3, %s1925_s5  ;;  %p1929_p11 = scmp.lt.u32.totalorder %s1925_s5, %s2308_s3 }
  0x39   :  { %p1931_p12 = pnand %p1929_p11, %p1926_p10 }
  0x3b   :  { %1934 = shalt.err (!%p1931_p12)
}
  0x3c   :  { %s1935_s10 = scalar_lea.vmem %s54_s19, 64  ;;  %p1940_p0 = scmp.lt.s32.totalorder %s54_s19, %s54_s19 }
  0x3d   :  { %p1936_p13 = scmp.ne.s32.totalorder %s54_s19, %s1935_s10  ;;  %p1941_p1 = scmp.lt.s32.totalorder %s1935_s10, %s1935_s10 }
  0x3f   :  { %p1942_p2 = por %p1941_p1, %p1940_p0 }
  0x41   :  { %p1943_p3 = pnand %p1942_p2, %p1936_p13 }
  0x43   :  { %1946 = shalt.err (!%p1943_p3)
}
  0x44   :  { %56 = dma.hbm_to_vmem [thread:$0]  %s2308_s3, 64, %s54_s19, [#allocation9]  }
  0x45   :  { %1969 = dma.done.wait [#allocation3], 256  }
  0x46   :  { %1970 = vsyncadd [#allocation3], 4294967040 }
  0x47   :  { %1971 = dma.done.wait [#allocation6], 1408  }
  0x48   :  { %1972 = vsyncadd [#allocation6], 4294965888 }
  0x49   :  { %1973 = dma.done.wait [#allocation9], 64  }
  0x4a   :  { %1974 = vsyncadd [#allocation9], 4294967232  ;;  %v1985_v0 = vmov 0.0   ;;  %vm1986_vm0 = vmmov 0   ;;  %v1807_v1 = vld [vmem:[#allocation5 + $0x10] sm:$0xff]   ;;  %v1808_v2 = vld [vmem:[#allocation5] sm:$0xff]  }
  0x4b   :  { %1649 = vmatprep.subr.bf16.mxu1 %v1985_v0  ;;  %1641 = vmatprep.subr.bf16.mxu0 %v1985_v0  ;;  %v1809_v3 = vld [vmem:[#allocation5 + $0x18] sm:$0xff]   ;;  %v2074_v4 = vld [vmem:[#allocation2] sm:$0xff]  ;;  %v1810_v6 = vld [vmem:[#allocation5 + $0x8] sm:$0xff]   ;;  %vm118_vm1 = vcmask 261120   ;;  %vm285_vm2 = vcmask 64512   ;;  %s1987_s3 = smov 120  }
  0x4c   :  { %1653 = vmatprep.mubr.msk.bf16.mxu1 %vm1986_vm0, %v1985_v0  ;;  %1645 = vmatprep.mubr.msk.bf16.mxu0 %vm1986_vm0, %v1985_v0  ;;  %v2076_v5 = vld [vmem:[#allocation2 + $0x8] sm:$0xff]  ;;  %v1811_v8 = vld [vmem:[#allocation5 + $0x20] sm:$0xff]   ;;  %v1812_v9 = vld [vmem:[#allocation5 + $0x28] sm:$0xff]   ;;  %vm405_vm3 = vcmask 1043456   ;;  %s1988_s12 = smov 112   ;;  %s1989_s14 = smov 104  }
  0x4d   :  { %1650 = vmatpush3.bf16.msra.mxu1 %v1807_v1  ;;  %1642 = vmatpush3.bf16.msra.mxu0 %v1808_v2  ;;  %v72_v7 = vpack.c.bf16 %v2076_v5, %v2074_v4  ;;  %v1552_v10 = vld [vmem:[#allocation7 + $0x1] ss:$0 sm:$0xff]  ;;  %v1548_v11 = vld [vmem:[#allocation7] ss:$0 sm:$0xff]  ;;  %v1556_v36 = vld [vmem:[#allocation7 + $0x2] ss:$0 sm:$0xff] }
  0x4e   :  { %1651 = vmatprep.subr.bf16.mxu1 %v1985_v0  ;;  %1643 = vmatprep.subr.bf16.mxu0 %v1985_v0  ;;  %s1990_s15 = smov [#allocation10]  }
  0x4f   :  { %s1534_s16 = sshll.u32 %s1990_s15, 4  ;;  %s1535_s16 = int_to_ptr.vmem [resolvable:$true] %s1534_s16 }
  0x50   :  { %s1947_s17 = scalar_lea.vmem %s1535_s16, 256  ;;  %p1952_p5 = scmp.lt.s32.totalorder %s1535_s16, %s1535_s16 }
  0x51   :  { %1652 = vmatpush3.bf16.msra.mxu1 %v1809_v3  ;;  %1644 = vmatpush3.bf16.msra.mxu0 %v1810_v6  ;;  %p1948_p4 = scmp.ne.s32.totalorder %s1535_s16, %s1947_s17  ;;  %p1953_p6 = scmp.lt.s32.totalorder %s1947_s17, %s1947_s17 }
  0x52   :  { %1665 = vmatprep.subr.bf16.mxu1 %v1985_v0  ;;  %1657 = vmatprep.subr.bf16.mxu0 %v1985_v0 }
  0x53   :  { %p1954_p7 = por %p1953_p6, %p1952_p5 }
  0x54   :  { %1654 = vmatmul.mubr.msk.bf16.vlgmr.msra.gmra.mrb[0].mxu1 %vm118_vm1, %v72_v7  ;;  %1646 = vmatmul.mubr.msk.bf16.vlgmr.msra.gmra.mrb[0].mxu0 %vm118_vm1, %v72_v7 }
  0x55   :  { %1667 = vmatprep.mubr.msk.bf16.mxu1 %vm1986_vm0, %v1985_v0  ;;  %1658 = vmatpush3.bf16.msra.mxu0 %v1811_v8  ;;  %p1955_p8 = pnand %p1954_p7, %p1948_p4 }
  0x56   :  { %1661 = vmatprep.mubr.msk.bf16.mxu0 %vm1986_vm0, %v1985_v0  ;;  %1659 = vmatprep.subr.bf16.mxu0 %v1985_v0 }
  0x59   :  { %1660 = vmatpush3.bf16.msra.mxu0 %v1812_v9 }
  0x5a   :  { %1671 = vmatprep.subr.bf16.mxu0 %v1985_v0 }
  0x5c   :  { %1662 = vmatmul.mubr.msk.bf16.vlgmr.msra.gmra.mrb[4].mxu0 %vm118_vm1, %v72_v7 }
  0x5d   :  { %1673 = vmatprep.mubr.msk.bf16.mxu0 %vm1986_vm0, %v1985_v0 }
 0x127   :  { %v213_v12 = vpop.f32.mrb[0].mxu1  ;;  %v156_v15 = vpop.f32.mrb[0].mxu0 }
 0x128   :  { %v214_v13 = vadd.f32 %v1552_v10, %v213_v12  ;;  %v1655_v14 = vpop.f32.mrb[1].mxu1  ;;  %v157_v17 = vadd.f32 %v1548_v11, %v156_v15  ;;  %v1647_v18 = vpop.f32.mrb[1].mxu0 }
 0x129   :  { %v216_v16 = vpop.f32.mrb[2].mxu1  ;;  %v159_v22 = vpop.f32.mrb[2].mxu0 }
 0x12a   :  { %v2094_v19 = vpack.c.bf16 %v214_v13, %v214_v13  ;;  %v217_v20 = vadd.f32 %v1552_v10, %v216_v16  ;;  %v1656_v21 = vpop.f32.mrb[3].mxu1  ;;  %v1648_v23 = vpop.f32.mrb[3].mxu0  ;;  %v277_v25 = vmul.f32 0.35355338, %v157_v17  ;;  %v160_v26 = vadd.f32 %v1548_v11, %v159_v22 }
 0x12c   :  { %v2096_v24 = vpack.c.bf16 %v217_v20, %v217_v20  ;;  %v290_v27 = vsel %vm285_vm2, %v2094_v19, 0  ;;  %v2105_v29 = vpack.c.bf16 %v277_v25, %v277_v25  ;;  %v278_v30 = vmul.f32 0.35355338, %v160_v26 }
 0x12d   :  { %1666 = vmatpush3.bf16.xpose.msra.mxu1 %v290_v27 }
 0x12e   :  { %552 = vrot.lane.b32.xlu1 %v2096_v24, %s1987_s3  ;;  %v336_v28 = vsel %vm285_vm2, %v2096_v24, 0  ;;  %1677 = vmatprep.subr.bf16.mxu1 %v1985_v0  ;;  %v2108_v35 = vpack.c.bf16 %v278_v30, %v278_v30 }
 0x12f   :  { %1672 = vmatpush3.bf16.xpose.msra.mxu0 %v336_v28  ;;  %v270_v31 = vpop.f32.mrb[4].mxu0 }
 0x130   :  { %1683 = vmatprep.subr.bf16.mxu0 %v1985_v0  ;;  %v1663_v32 = vpop.f32.mrb[5].mxu0  ;;  %v271_v37 = vadd.f32 %v1556_v36, %v270_v31 }
 0x131   :  { %v273_v33 = vpop.f32.mrb[6].mxu0 }
 0x132   :  { %v1664_v34 = vpop.f32.mrb[7].mxu0  ;;  %v274_v38 = vadd.f32 %v1556_v36, %v273_v33  ;;  %v2118_v39 = vpack.c.bf16 %v271_v37, %v271_v37 }
 0x134   :  { %1668 = vmatmul.mubr.msk.bf16.vlgmr.msra.gmra.mrb[4].mxu1 %vm285_vm2, %v2105_v29  ;;  %v2120_v40 = vpack.c.bf16 %v274_v38, %v274_v38  ;;  %v407_v41 = vsel %vm405_vm3, %v2118_v39, 0 }
 0x135   :  { %1679 = vmatprep.mubr.msk.bf16.mxu1 %vm1986_vm0, %v1985_v0  ;;  %1678 = vmatpush3.bf16.msra.mxu1 %v407_v41 }
 0x136   :  { %1674 = vmatmul.mubr.msk.bf16.vlgmr.msra.gmra.mrb[8].mxu0 %vm285_vm2, %v2108_v35  ;;  %v453_v42 = vsel %vm405_vm3, %v2120_v40, 0  ;;  %1689 = vmatprep.subr.bf16.mxu1 %v1985_v0 }
 0x137   :  { %1685 = vmatprep.mubr.msk.bf16.mxu0 %vm1986_vm0, %v1985_v0  ;;  %1684 = vmatpush3.bf16.msra.mxu0 %v453_v42 }
 0x138   :  { %1695 = vmatprep.subr.bf16.mxu0 %v1985_v0 }
 0x1a0   :  { %v553_v63 = vpop.permute.xlu1 %552 }
 0x1a1   :  { %v558_v13 = vsel %vm285_vm2, %v553_v63, 0  ;;  %v88_v63 = vld [vmem:[#allocation5 + $0x30] sm:$0xf] }
 0x207   :  { %v326_v43 = vpop.f32.mrb[4].mxu1 }
 0x208   :  { %v1669_v44 = vpop.f32.mrb[5].mxu1  ;;  %v378_v45 = vsel %vm285_vm2, %v326_v43, -inf }
 0x209   :  { %379 = vmax.xlane.f32.xlu0 %v378_v45  ;;  %v329_v46 = vpop.f32.mrb[6].mxu1  ;;  %v372_v47 = vpop.f32.mrb[8].mxu0 }
 0x20a   :  { %v1670_v48 = vpop.f32.mrb[7].mxu1  ;;  %v1675_v49 = vpop.f32.mrb[9].mxu0  ;;  %v381_v52 = vsel %vm285_vm2, %v372_v47, -inf }
 0x20b   :  { %v375_v50 = vpop.f32.mrb[10].mxu0 }
 0x20c   :  { %v1676_v51 = vpop.f32.mrb[11].mxu0 }
 0x20d   :  { %382 = vmax.xlane.f32.xlu0 %v381_v52 }
 0x223   :  { %500 = vrot.lane.b32.xlu0 %v2094_v19, %s1987_s3 }
 0x296   :  { %v380_v53 = vpop.xlane.xlu0 %379 }
 0x297   :  { %v384_v54 = vsub.f32 %v326_v43, %v380_v53 }
 0x299   :  { %v386_v55 = vmul.f32 1.442695, %v384_v54 }
 0x29a   :  { %v383_v56 = vpop.xlane.xlu0 %382 }
 0x29b   :  { %1815 = vpow2.f32 %v386_v55  ;;  %v385_v57 = vsub.f32 %v372_v47, %v383_v56 }
 0x29d   :  { %v388_v58 = vmul.f32 1.442695, %v385_v57 }
 0x29e   :  { %v501_v7 = vpop.permute.xlu0 %500 }
 0x29f   :  { %1817 = vpow2.f32 %v388_v58  ;;  %v506_v10 = vsel %vm285_vm2, %v501_v7, 0  ;;  %v89_v58 = vld [vmem:[#allocation5 + $0x34] sm:$0xf] }
 0x2a5   :  { %v1816_v59 = vpop.eup %1815 }
 0x2a6   :  { %v390_v60 = vsel %vm285_vm2, %v1816_v59, 0.0 }
 0x2a7   :  { %391 = vadd.xlane.f32.xlu1 %v390_v60 }
 0x2a9   :  { %v1818_v61 = vpop.eup %1817 }
 0x2aa   :  { %v393_v62 = vsel %vm285_vm2, %v1818_v61, 0.0 }
 0x2ab   :  { %394 = vadd.xlane.f32.xlu1 %v393_v62 }
 0x2bc   :  { %497 = vrot.lane.b32.xlu1 %v2105_v29, %s1987_s3 }
 0x2c0   :  { %549 = vrot.lane.b32.xlu1 %v2108_v35, %s1987_s3 }
 0x334   :  { %v392_v1 = vpop.xlane.xlu1 %391 }
 0x335   :  { %1819 = vrcp.f32 %v392_v1 }
 0x338   :  { %v395_v2 = vpop.xlane.xlu1 %394 }
 0x339   :  { %1821 = vrcp.f32 %v395_v2 }
 0x33c   :  { %v498_v14 = vpop.permute.xlu1 %497 }
 0x33f   :  { %v1820_v3 = vpop.eup %1819 }
 0x340   :  { %v398_v6 = vmul.f32 %v1820_v3, %v1816_v59  ;;  %v550_v15 = vpop.permute.xlu1 %549  ;;  %v774_v3 = vsel %vm405_vm3, %v88_v63, 0 }
 0x342   :  { %v400_v8 = vpack.c.bf16 %v398_v6, %v398_v6 }
 0x343   :  { %v1822_v9 = vpop.eup %1821 }
 0x344   :  { %v399_v11 = vmul.f32 %v1822_v9, %v1818_v61  ;;  %1680 = vmatmul.mubr.msk.bf16.vlgmr.msra.gmra.mrb[8].mxu1 %vm285_vm2, %v400_v8  ;;  %v727_v61 = vsel %vm405_vm3, %v89_v58, 0 }
 0x345   :  { %1690 = vmatpush3.bf16.xpose.msra.mxu1 %v506_v10  ;;  %1691 = vmatprep.mubr.msk.bf16.mxu1 %vm1986_vm0, %v1985_v0 }
 0x346   :  { %v401_v12 = vpack.c.bf16 %v399_v11, %v399_v11  ;;  %1701 = vmatprep.subr.bf16.mxu1 %v1985_v0 }
 0x348   :  { %1686 = vmatmul.mubr.msk.bf16.vlgmr.msra.gmra.mrb[12].mxu0 %vm285_vm2, %v401_v12 }
 0x349   :  { %1696 = vmatpush3.bf16.xpose.msra.mxu0 %v558_v13  ;;  %1697 = vmatprep.mubr.msk.bf16.mxu0 %vm1986_vm0, %v1985_v0 }
 0x34a   :  { %1707 = vmatprep.subr.bf16.mxu0 %v1985_v0 }
 0x34c   :  { %1692 = vmatmul.mubr.msk.bf16.vlgmr.msra.gmra.mrb[12].mxu1 %vm285_vm2, %v498_v14 }
 0x34d   :  { %1703 = vmatprep.mubr.msk.bf16.mxu1 %vm1986_vm0, %v1985_v0 }
 0x350   :  { %1698 = vmatmul.mubr.msk.bf16.vlgmr.msra.gmra.mrb[16].mxu0 %vm285_vm2, %v550_v15 }
 0x351   :  { %1709 = vmatprep.mubr.msk.bf16.mxu0 %vm1986_vm0, %v1985_v0 }
 0x417   :  { %v2154_v16 = vpop.f32.mrb[8].mxu1 }
 0x418   :  { %v1681_v17 = vpop.f32.mrb[9].mxu1 }
 0x419   :  { %v446_v18 = vpop.f32.mrb[10].mxu1 }
 0x41a   :  { %v1682_v20 = vpop.f32.mrb[11].mxu1 }
 0x41b   :  { %v2156_v21 = vpop.f32.mrb[12].mxu0 }
 0x41c   :  { %v495_v22 = vpack.c.bf16 %v2156_v21, %v2154_v16  ;;  %v1687_v23 = vpop.f32.mrb[13].mxu0 }
 0x41d   :  { %v492_v25 = vpop.f32.mrb[14].mxu0 }
 0x41e   :  { %v1688_v26 = vpop.f32.mrb[15].mxu0 }
 0x41f   :  { %v542_v27 = vpop.f32.mrb[12].mxu1 }
 0x420   :  { %v1693_v28 = vpop.f32.mrb[13].mxu1  ;;  %v600_v30 = vsel %vm285_vm2, %v542_v27, -inf }
 0x421   :  { %601 = vmax.xlane.f32.xlu0 %v600_v30  ;;  %v545_v31 = vpop.f32.mrb[14].mxu1 }
 0x422   :  { %v1694_v32 = vpop.f32.mrb[15].mxu1 }
 0x423   :  { %v594_v33 = vpop.f32.mrb[16].mxu0 }
 0x424   :  { %v1699_v34 = vpop.f32.mrb[17].mxu0  ;;  %v603_v36 = vsel %vm285_vm2, %v594_v33, -inf }
 0x425   :  { %604 = vmax.xlane.f32.xlu1 %v603_v36  ;;  %v597_v37 = vpop.f32.mrb[18].mxu0 }
 0x426   :  { %v1700_v38 = vpop.f32.mrb[19].mxu0 }
 0x436   :  { %674 = vrot.lane.b32.xlu1 %v2120_v40, %s1987_s3 }
 0x43a   :  { %819 = vrot.lane.b32.xlu1 %v2094_v19, %s1988_s12 }
 0x43e   :  { %869 = vrot.lane.b32.xlu1 %v2096_v24, %s1988_s12 }
 0x442   :  { %867 = vrot.lane.b32.xlu1 %v2108_v35, %s1988_s12 }
 0x4ae   :  { %v602_v41 = vpop.xlane.xlu0 %601 }
 0x4af   :  { %v606_v42 = vsub.f32 %v542_v27, %v602_v41 }
 0x4b1   :  { %v608_v43 = vmul.f32 1.442695, %v606_v42 }
 0x4b2   :  { %v605_v44 = vpop.xlane.xlu1 %604 }
 0x4b3   :  { %1823 = vpow2.f32 %v608_v43  ;;  %v607_v45 = vsub.f32 %v594_v33, %v605_v44 }
 0x4b5   :  { %v610_v46 = vmul.f32 1.442695, %v607_v45 }
 0x4b6   :  { %v675_v47 = vpop.permute.xlu1 %674 }
 0x4b7   :  { %1825 = vpow2.f32 %v610_v46  ;;  %v680_v48 = vsel %vm405_vm3, %v675_v47, 0 }
 0x4b8   :  { %1708 = vmatpush3.bf16.msra.mxu0 %v680_v48 }
 0x4b9   :  { %1719 = vmatprep.subr.bf16.mxu0 %v1985_v0 }
 0x4ba   :  { %v820_v6 = vpop.permute.xlu1 %819 }
 0x4bb   :  { %v825_v18 = vsel %vm285_vm2, %v820_v6, 0 }
 0x4bd   :  { %v1824_v49 = vpop.eup %1823 }
 0x4be   :  { %v612_v50 = vsel %vm285_vm2, %v1824_v49, 0.0  ;;  %v870_v7 = vpop.permute.xlu1 %869 }
 0x4bf   :  { %613 = vadd.xlane.f32.xlu0 %v612_v50  ;;  %v875_v8 = vsel %vm285_vm2, %v870_v7, 0 }
 0x4c1   :  { %v1826_v51 = vpop.eup %1825 }
 0x4c2   :  { %v615_v52 = vsel %vm285_vm2, %v1826_v51, 0.0  ;;  %v868_v9 = vpop.permute.xlu1 %867 }
 0x4c3   :  { %616 = vadd.xlane.f32.xlu0 %v615_v52 }
 0x4d9   :  { %625 = vrot.lane.b32.xlu0 %v2118_v39, %s1987_s3 }
 0x4dd   :  { %817 = vrot.lane.b32.xlu0 %v2105_v29, %s1988_s12 }
 0x54c   :  { %v614_v53 = vpop.xlane.xlu0 %613 }
 0x54d   :  { %1827 = vrcp.f32 %v614_v53 }
 0x550   :  { %v617_v54 = vpop.xlane.xlu0 %616 }
 0x551   :  { %1829 = vrcp.f32 %v617_v54 }
 0x554   :  { %v626_v55 = vpop.permute.xlu0 %625 }
 0x555   :  { %v631_v56 = vsel %vm405_vm3, %v626_v55, 0 }
 0x556   :  { %1702 = vmatpush3.bf16.msra.mxu1 %v631_v56 }
 0x557   :  { %v1828_v57 = vpop.eup %1827  ;;  %1713 = vmatprep.subr.bf16.mxu1 %v1985_v0 }
 0x558   :  { %v620_v59 = vmul.f32 %v1828_v57, %v1824_v49  ;;  %v818_v23 = vpop.permute.xlu0 %817 }
 0x55a   :  { %v622_v60 = vpack.c.bf16 %v620_v59, %v620_v59 }
 0x55b   :  { %v1830_v62 = vpop.eup %1829 }
 0x55c   :  { %v621_v1 = vmul.f32 %v1830_v62, %v1826_v51  ;;  %1704 = vmatmul.mubr.msk.bf16.vlgmr.msra.gmra.mrb[16].mxu1 %vm285_vm2, %v622_v60 }
 0x55d   :  { %1714 = vmatpush3.bf16.msra.mxu1 %v727_v61  ;;  %1715 = vmatprep.mubr.msk.bf16.mxu1 %vm1986_vm0, %v1985_v0 }
 0x55e   :  { %v623_v2 = vpack.c.bf16 %v621_v1, %v621_v1  ;;  %1725 = vmatprep.subr.bf16.mxu1 %v1985_v0 }
 0x560   :  { %1710 = vmatmul.mubr.msk.bf16.vlgmr.msra.gmra.mrb[20].mxu0 %vm285_vm2, %v623_v2 }
 0x561   :  { %1720 = vmatpush3.bf16.msra.mxu0 %v774_v3  ;;  %1721 = vmatprep.mubr.msk.bf16.mxu0 %vm1986_vm0, %v1985_v0 }
 0x562   :  { %1731 = vmatprep.subr.bf16.mxu0 %v1985_v0 }
 0x568   :  { %1722 = vmatmul.mubr.msk.bf16.vlgmr.msra.gmra.mrb[24].mxu0 %vm285_vm2, %v495_v22 }
 0x569   :  { %1733 = vmatprep.mubr.msk.bf16.mxu0 %vm1986_vm0, %v1985_v0 }
 0x56a   :  { %1732 = vmatpush3.bf16.xpose.msra.mxu0 %v875_v8 }
 0x56b   :  { %1743 = vmatprep.subr.bf16.mxu0 %v1985_v0 }
 0x571   :  { %1734 = vmatmul.mubr.msk.bf16.vlgmr.msra.gmra.mrb[28].mxu0 %vm285_vm2, %v868_v9 }
 0x572   :  { %1745 = vmatprep.mubr.msk.bf16.mxu0 %vm1986_vm0, %v1985_v0 }
 0x62f   :  { %v667_v10 = vpop.f32.mrb[16].mxu1 }
 0x630   :  { %v1705_v11 = vpop.f32.mrb[17].mxu1 }
 0x631   :  { %v670_v12 = vpop.f32.mrb[18].mxu1  ;;  %v90_v11 = vld [vmem:[#allocation5 + $0x38] sm:$0xf] }
 0x632   :  { %v1706_v13 = vpop.f32.mrb[19].mxu1  ;;  %v1042_v12 = vsel %vm405_vm3, %v90_v11, 0 }
 0x633   :  { %v716_v14 = vpop.f32.mrb[20].mxu0 }
 0x634   :  { %v722_v15 = vpack.c.bf16 %v716_v14, %v667_v10  ;;  %v1711_v16 = vpop.f32.mrb[21].mxu0 }
 0x635   :  { %v719_v17 = vpop.f32.mrb[22].mxu0 }
 0x636   :  { %v1712_v20 = vpop.f32.mrb[23].mxu0  ;;  %1716 = vmatmul.mubr.msk.bf16.vlgmr.msra.gmra.mrb[20].mxu1 %vm285_vm2, %v722_v15 }
 0x637   :  { %1726 = vmatpush3.bf16.xpose.msra.mxu1 %v825_v18  ;;  %1727 = vmatprep.mubr.msk.bf16.mxu1 %vm1986_vm0, %v1985_v0 }
 0x638   :  { %1737 = vmatprep.subr.bf16.mxu1 %v1985_v0 }
 0x63b   :  { %v810_v21 = vpop.f32.mrb[24].mxu0 }
 0x63c   :  { %v1723_v22 = vpop.f32.mrb[25].mxu0 }
 0x63d   :  { %v813_v25 = vpop.f32.mrb[26].mxu0 }
 0x63e   :  { %v1724_v26 = vpop.f32.mrb[27].mxu0  ;;  %1728 = vmatmul.mubr.msk.bf16.vlgmr.msra.gmra.mrb[24].mxu1 %vm285_vm2, %v818_v23 }
 0x63f   :  { %1739 = vmatprep.mubr.msk.bf16.mxu1 %vm1986_vm0, %v1985_v0 }
 0x644   :  { %v911_v27 = vpop.f32.mrb[28].mxu0 }
 0x645   :  { %v1735_v28 = vpop.f32.mrb[29].mxu0  ;;  %v920_v30 = vsel %vm285_vm2, %v911_v27, -inf }
 0x646   :  { %921 = vmax.xlane.f32.xlu1 %v920_v30  ;;  %v914_v31 = vpop.f32.mrb[30].mxu0 }
 0x647   :  { %v1736_v32 = vpop.f32.mrb[31].mxu0 }
 0x657   :  { %989 = vrot.lane.b32.xlu1 %v2120_v40, %s1988_s12 }
 0x65b   :  { %1089 = vrot.lane.b32.xlu1 %v2094_v19, %s1989_s14 }
 0x65f   :  { %1139 = vrot.lane.b32.xlu1 %v2096_v24, %s1989_s14 }
 0x663   :  { %1137 = vrot.lane.b32.xlu1 %v2108_v35, %s1989_s14 }
 0x6d3   :  { %v922_v33 = vpop.xlane.xlu1 %921 }
 0x6d4   :  { %v924_v37 = vsub.f32 %v911_v27, %v922_v33 }
 0x6d6   :  { %v927_v38 = vmul.f32 1.442695, %v924_v37 }
 0x6d7   :  { %v990_v34 = vpop.permute.xlu1 %989 }
 0x6d8   :  { %v995_v36 = vsel %vm405_vm3, %v990_v34, 0  ;;  %1831 = vpow2.f32 %v927_v38 }
 0x6d9   :  { %1744 = vmatpush3.bf16.msra.mxu0 %v995_v36 }
 0x6da   :  { %1755 = vmatprep.subr.bf16.mxu0 %v1985_v0 }
 0x6db   :  { %v1090_v59 = vpop.permute.xlu1 %1089 }
 0x6dc   :  { %v1095_v61 = vsel %vm285_vm2, %v1090_v59, 0 }
 0x6df   :  { %v1140_v18 = vpop.permute.xlu1 %1139 }
 0x6e2   :  { %v1832_v47 = vpop.eup %1831 }
 0x6e3   :  { %v932_v50 = vsel %vm285_vm2, %v1832_v47, 0.0  ;;  %v1138_v27 = vpop.permute.xlu1 %1137 }
 0x709   :  { %v763_v41 = vpop.f32.mrb[20].mxu1 }
 0x70a   :  { %v2220_v42 = vadd.f32 %v810_v21, %v763_v41  ;;  %v1717_v19 = vpop.f32.mrb[21].mxu1 }
 0x70b   :  { %v766_v43 = vpop.f32.mrb[22].mxu1 }
 0x70c   :  { %v2222_v44 = vadd.f32 %v813_v25, %v766_v43  ;;  %v1718_v24 = vpop.f32.mrb[23].mxu1  ;;  %v1145_v25 = vsel %vm285_vm2, %v1140_v18, 0 }
 0x711   :  { %v861_v45 = vpop.f32.mrb[24].mxu1 }
 0x712   :  { %v1729_v35 = vpop.f32.mrb[25].mxu1  ;;  %v917_v46 = vsel %vm285_vm2, %v861_v45, -inf }
 0x713   :  { %918 = vmax.xlane.f32.xlu0 %v917_v46  ;;  %v864_v48 = vpop.f32.mrb[26].mxu1 }
 0x714   :  { %v1730_v49 = vpop.f32.mrb[27].mxu1 }
 0x717   :  { %933 = vadd.xlane.f32.xlu0 %v932_v50 }
 0x7a0   :  { %v919_v51 = vpop.xlane.xlu0 %918 }
 0x7a1   :  { %v923_v52 = vsub.f32 %v861_v45, %v919_v51 }
 0x7a3   :  { %v925_v53 = vmul.f32 1.442695, %v923_v52 }
 0x7a4   :  { %v934_v54 = vpop.xlane.xlu0 %933 }
 0x7a5   :  { %1833 = vpow2.f32 %v925_v53 }
 0x7a6   :  { %1835 = vrcp.f32 %v934_v54 }
 0x7af   :  { %v1834_v55 = vpop.eup %1833 }
 0x7b0   :  { %v1836_v56 = vpop.eup %1835  ;;  %v929_v57 = vsel %vm285_vm2, %v1834_v55, 0.0 }
 0x7b1   :  { %v938_v58 = vmul.f32 %v1836_v56, %v1832_v47  ;;  %930 = vadd.xlane.f32.xlu0 %v929_v57 }
 0x7b3   :  { %v940_v60 = vpack.c.bf16 %v938_v58, %v938_v58 }
 0x7b5   :  { %1746 = vmatmul.mubr.msk.bf16.vlgmr.msra.gmra.mrb[32].mxu0 %vm285_vm2, %v940_v60  ;;  %v91_v60 = vld [vmem:[#allocation5 + $0x3c] sm:$0xf] }
 0x7b6   :  { %1756 = vmatpush3.bf16.xpose.msra.mxu0 %v1095_v61  ;;  %1757 = vmatprep.mubr.msk.bf16.mxu0 %vm1986_vm0, %v1985_v0  ;;  %v1312_v61 = vsel %vm405_vm3, %v91_v60, 0 }
 0x7b7   :  { %1767 = vmatprep.subr.bf16.mxu0 %v1985_v0 }
 0x7c7   :  { %941 = vrot.lane.b32.xlu0 %v2118_v39, %s1988_s12 }
 0x7cb   :  { %1087 = vrot.lane.b32.xlu0 %v2105_v29, %s1989_s14 }
 0x83e   :  { %v931_v62 = vpop.xlane.xlu0 %930 }
 0x83f   :  { %1837 = vrcp.f32 %v931_v62 }
 0x842   :  { %v942_v63 = vpop.permute.xlu0 %941 }
 0x843   :  { %v947_v1 = vsel %vm405_vm3, %v942_v63, 0 }
 0x844   :  { %1738 = vmatpush3.bf16.msra.mxu1 %v947_v1 }
 0x845   :  { %1749 = vmatprep.subr.bf16.mxu1 %v1985_v0 }
 0x846   :  { %v1088_v2 = vpop.permute.xlu0 %1087 }
 0x847   :  { %1758 = vmatmul.mubr.msk.bf16.vlgmr.msra.gmra.mrb[36].mxu0 %vm285_vm2, %v1088_v2 }
 0x848   :  { %1769 = vmatprep.mubr.msk.bf16.mxu0 %vm1986_vm0, %v1985_v0 }
 0x849   :  { %v1838_v3 = vpop.eup %1837 }
 0x84a   :  { %v937_v6 = vmul.f32 %v1838_v3, %v1834_v55 }
 0x84c   :  { %v939_v7 = vpack.c.bf16 %v937_v6, %v937_v6 }
 0x84e   :  { %1740 = vmatmul.mubr.msk.bf16.vlgmr.msra.gmra.mrb[28].mxu1 %vm285_vm2, %v939_v7 }
 0x84f   :  { %1751 = vmatprep.mubr.msk.bf16.mxu1 %vm1986_vm0, %v1985_v0  ;;  %1750 = vmatpush3.bf16.msra.mxu1 %v1042_v12 }
 0x850   :  { %1761 = vmatprep.subr.bf16.mxu1 %v1985_v0 }
 0x888   :  { %v1031_v29 = vpop.f32.mrb[32].mxu0 }
 0x889   :  { %v1747_v8 = vpop.f32.mrb[33].mxu0 }
 0x88a   :  { %v1034_v9 = vpop.f32.mrb[34].mxu0 }
 0x88b   :  { %v1748_v10 = vpop.f32.mrb[35].mxu0  ;;  %v1580_v9 = vld [vmem:[#allocation7 + $0x3] ss:$0 sm:$0xff] }
 0x91a   :  { %v1131_v13 = vpop.f32.mrb[36].mxu0 }
 0x91b   :  { %v1759_v14 = vpop.f32.mrb[37].mxu0  ;;  %v1187_v15 = vsel %vm285_vm2, %v1131_v13, -inf }
 0x91c   :  { %1188 = vmax.xlane.f32.xlu0 %v1187_v15  ;;  %v1134_v16 = vpop.f32.mrb[38].mxu0 }
 0x91d   :  { %v1760_v17 = vpop.f32.mrb[39].mxu0 }
 0x921   :  { %v983_v20 = vpop.f32.mrb[28].mxu1 }
 0x922   :  { %v1037_v21 = vpack.c.bf16 %v1031_v29, %v983_v20  ;;  %v1741_v22 = vpop.f32.mrb[29].mxu1 }
 0x923   :  { %v986_v23 = vpop.f32.mrb[30].mxu1 }
 0x924   :  { %v1742_v26 = vpop.f32.mrb[31].mxu1  ;;  %1752 = vmatmul.mubr.msk.bf16.vlgmr.msra.gmra.mrb[32].mxu1 %vm285_vm2, %v1037_v21 }
 0x925   :  { %1762 = vmatpush3.bf16.xpose.msra.mxu1 %v1145_v25  ;;  %1763 = vmatprep.mubr.msk.bf16.mxu1 %vm1986_vm0, %v1985_v0 }
 0x926   :  { %1773 = vmatprep.subr.bf16.mxu1 %v1985_v0 }
 0x92c   :  { %1764 = vmatmul.mubr.msk.bf16.vlgmr.msra.gmra.mrb[36].mxu1 %vm285_vm2, %v1138_v27 }
 0x92d   :  { %1775 = vmatprep.mubr.msk.bf16.mxu1 %vm1986_vm0, %v1985_v0 }
 0x9a9   :  { %v1189_v28 = vpop.xlane.xlu0 %1188 }
 0x9aa   :  { %v1193_v30 = vsub.f32 %v1131_v13, %v1189_v28 }
 0x9ac   :  { %v1195_v31 = vmul.f32 1.442695, %v1193_v30 }
 0x9ae   :  { %1839 = vpow2.f32 %v1195_v31 }
 0x9b8   :  { %v1840_v32 = vpop.eup %1839 }
 0x9b9   :  { %v1199_v33 = vsel %vm285_vm2, %v1840_v32, 0.0 }
 0x9ba   :  { %1200 = vadd.xlane.f32.xlu0 %v1199_v33 }
 0x9f7   :  { %v1078_v34 = vpop.f32.mrb[32].mxu1 }
 0x9f8   :  { %v1085_v36 = vadd.f32 %v1078_v34, %v2220_v42  ;;  %v1753_v37 = vpop.f32.mrb[33].mxu1  ;;  %v1813_v34 = vld [vmem:[#allocation5 + $0x40] sm:$0xff]  }
 0x9f9   :  { %v1081_v38 = vpop.f32.mrb[34].mxu1 }
 0x9fa   :  { %v1086_v41 = vadd.f32 %v1081_v38, %v2222_v44  ;;  %v1754_v19 = vpop.f32.mrb[35].mxu1 }
 0x9ff   :  { %v1181_v43 = vpop.f32.mrb[36].mxu1 }
 0xa00   :  { %v1765_v24 = vpop.f32.mrb[37].mxu1  ;;  %v1190_v45 = vsel %vm285_vm2, %v1181_v43, -inf }
 0xa01   :  { %1191 = vmax.xlane.f32.xlu1 %v1190_v45  ;;  %v1184_v35 = vpop.f32.mrb[38].mxu1  ;;  %v1581_v45 = vld [vmem:[#allocation8] ss:$0 sm:$0xff] }
 0xa02   :  { %v1766_v46 = vpop.f32.mrb[39].mxu1 }
 0xa12   :  { %1259 = vrot.lane.b32.xlu1 %v2120_v40, %s1989_s14 }
 0xa47   :  { %v1201_v52 = vpop.xlane.xlu0 %1200 }
 0xa8e   :  { %v1192_v47 = vpop.xlane.xlu1 %1191 }
 0xa8f   :  { %v1194_v48 = vsub.f32 %v1181_v43, %v1192_v47 }
 0xa91   :  { %v1197_v49 = vmul.f32 1.442695, %v1194_v48 }
 0xa92   :  { %v1260_v50 = vpop.permute.xlu1 %1259 }
 0xa93   :  { %1841 = vpow2.f32 %v1197_v49  ;;  %v1265_v42 = vsel %vm405_vm3, %v1260_v50, 0  ;;  %v1582_v49 = vld [vmem:[#allocation8 + $0x1] ss:$0 sm:$0xff] }
 0xa94   :  { %1774 = vmatpush3.bf16.msra.mxu1 %v1265_v42  ;;  %1843 = vrcp.f32 %v1201_v52 }
 0xa95   :  { %1785 = vmatprep.subr.bf16.mxu1 %v1985_v0 }
 0xa9d   :  { %v1842_v44 = vpop.eup %1841 }
 0xa9e   :  { %v1202_v51 = vsel %vm285_vm2, %v1842_v44, 0.0  ;;  %v1844_v40 = vpop.eup %1843 }
 0xa9f   :  { %1203 = vadd.xlane.f32.xlu0 %v1202_v51  ;;  %v1207_v54 = vmul.f32 %v1844_v40, %v1840_v32  ;;  %v1583_v51 = vld [vmem:[#allocation7 + $0x4] ss:$0 sm:$0xff] }
 0xaa1   :  { %v1209_v57 = vpack.c.bf16 %v1207_v54, %v1207_v54 }
 0xab5   :  { %1211 = vrot.lane.b32.xlu0 %v2118_v39, %s1989_s14 }
 0xb2c   :  { %v1204_v53 = vpop.xlane.xlu0 %1203 }
 0xb2d   :  { %1845 = vrcp.f32 %v1204_v53 }
 0xb30   :  { %v1212_v55 = vpop.permute.xlu0 %1211 }
 0xb31   :  { %v1217_v56 = vsel %vm405_vm3, %v1212_v55, 0 }
 0xb32   :  { %1768 = vmatpush3.bf16.msra.mxu0 %v1217_v56 }
 0xb33   :  { %1779 = vmatprep.subr.bf16.mxu0 %v1985_v0 }
 0xb35   :  { %1770 = vmatmul.mubr.msk.bf16.vlgmr.msra.gmra.mrb[40].mxu0 %vm285_vm2, %v1209_v57 }
 0xb36   :  { %1781 = vmatprep.mubr.msk.bf16.mxu0 %vm1986_vm0, %v1985_v0  ;;  %1780 = vmatpush3.bf16.msra.mxu0 %v1312_v61 }
 0xb37   :  { %v1846_v58 = vpop.eup %1845 }
 0xb38   :  { %v1208_v39 = vmul.f32 %v1846_v58, %v1842_v44 }
 0xb3a   :  { %v1210_v59 = vpack.c.bf16 %v1208_v39, %v1208_v39 }
 0xb3c   :  { %1776 = vmatmul.mubr.msk.bf16.vlgmr.msra.gmra.mrb[40].mxu1 %vm285_vm2, %v1210_v59 }
 0xb3d   :  { %1789 = vmatprep.mubr.msk.bf16.mxu1 %vm1986_vm0, %v1985_v0  ;;  %1786 = vmatpush3.bf16.msra.mxu1 %v1813_v34 }
 0xb3e   :  { %1787 = vmatprep.subr.bf16.mxu1 %v1985_v0 }
 0xc08   :  { %v1253_v62 = vpop.f32.mrb[40].mxu0 }
 0xc09   :  { %v1771_v63 = vpop.f32.mrb[41].mxu0 }
 0xc0a   :  { %v1256_v1 = vpop.f32.mrb[42].mxu0 }
 0xc0b   :  { %v1772_v2 = vpop.f32.mrb[43].mxu0 }
 0xc0f   :  { %v1301_v3 = vpop.f32.mrb[40].mxu1 }
 0xc10   :  { %v1307_v6 = vpack.c.bf16 %v1301_v3, %v1253_v62  ;;  %v1777_v7 = vpop.f32.mrb[41].mxu1 }
 0xc11   :  { %v1304_v29 = vpop.f32.mrb[42].mxu1 }
 0xc12   :  { %v1778_v8 = vpop.f32.mrb[43].mxu1  ;;  %1782 = vmatmul.mubr.msk.bf16.vlgmr.msra.gmra.mrb[44].mxu0 %vm285_vm2, %v1307_v6 }
 0xce5   :  { %v1348_v10 = vpop.f32.mrb[44].mxu0 }
 0xce6   :  { %v1355_v11 = vadd.f32 %v1348_v10, %v1085_v36  ;;  %v1783_v12 = vpop.f32.mrb[45].mxu0 }
 0xce7   :  { %v1351_v13 = vpop.f32.mrb[46].mxu0 }
 0xce8   :  { %v1361_v14 = vadd.f32 %v1580_v9, %v1355_v11  ;;  %v1356_v15 = vadd.f32 %v1351_v13, %v1086_v41  ;;  %v1784_v16 = vpop.f32.mrb[47].mxu0 }
 0xcea   :  { %v1362_v17 = vadd.f32 %v1580_v9, %v1356_v15  ;;  %v1363_v18 = vadd.f32 %v1361_v14, %v2074_v4 }
 0xcec   :  { %v1367_v20 = vsel %vm118_vm1, %v1363_v18, 0.0  ;;  %v1364_v21 = vadd.f32 %v1362_v17, %v2076_v5  ;;  %v1814_v5 = vld [vmem:[#allocation5 + $0x48] sm:$0xff]  }
 0xced   :  { %1368 = vadd.xlane.f32.xlu1 %v1367_v20  ;;  %1788 = vmatpush3.bf16.msra.mxu1 %v1814_v5  ;;  %v1587_v5 = vld [vmem:[#allocation8 + $0x2] ss:$0 sm:$0xff] }
 0xcee   :  { %v1370_v22 = vsel %vm118_vm1, %v1364_v21, 0.0 }
 0xcef   :  { %1371 = vadd.xlane.f32.xlu0 %v1370_v22 }
 0xd7a   :  { %v1369_v23 = vpop.xlane.xlu1 %1368 }
 0xd7b   :  { %v1374_v25 = vmul.f32 0.03125, %v1369_v23 }
 0xd7c   :  { %v1372_v26 = vpop.xlane.xlu0 %1371 }
 0xd7d   :  { %v1376_v27 = vsub.f32 %v1363_v18, %v1374_v25  ;;  %v1375_v28 = vmul.f32 0.03125, %v1372_v26 }
 0xd7f   :  { %v1377_v30 = vsub.f32 %v1364_v21, %v1375_v28  ;;  %v1378_v31 = vmul.f32 %v1376_v27, %v1376_v27 }
 0xd81   :  { %v1380_v32 = vsel %vm118_vm1, %v1378_v31, 0.0  ;;  %v1379_v33 = vmul.f32 %v1377_v30, %v1377_v30 }
 0xd82   :  { %1381 = vadd.xlane.f32.xlu0 %v1380_v32 }
 0xd83   :  { %v1383_v4 = vsel %vm118_vm1, %v1379_v33, 0.0 }
 0xd84   :  { %1384 = vadd.xlane.f32.xlu1 %v1383_v4 }
 0xe0f   :  { %v1382_v36 = vpop.xlane.xlu0 %1381 }
 0xe10   :  { %v1386_v37 = vmul.f32 0.03125, %v1382_v36 }
 0xe11   :  { %v1385_v38 = vpop.xlane.xlu1 %1384 }
 0xe12   :  { %v1388_v41 = vadd.f32 1e-05, %v1386_v37  ;;  %v1387_v19 = vmul.f32 0.03125, %v1385_v38  ;;  %v1588_v38 = vld [vmem:[#allocation8 + $0x3] ss:$0 sm:$0xff] }
 0xe14   :  { %1847 = vrsqrt.f32 %v1388_v41  ;;  %v1389_v43 = vadd.f32 1e-05, %v1387_v19 }
 0xe16   :  { %1849 = vrsqrt.f32 %v1389_v43 }
 0xe1e   :  { %v1848_v24 = vpop.eup %1847 }
 0xe1f   :  { %v1392_v35 = vmul.f32 %v1848_v24, %v1376_v27 }
 0xe20   :  { %v1850_v46 = vpop.eup %1849 }
 0xe21   :  { %v1398_v47 = vmul.f32 %v1581_v45, %v1392_v35  ;;  %v1393_v48 = vmul.f32 %v1850_v46, %v1377_v30 }
 0xe23   :  { %v1399_v50 = vmul.f32 %v1581_v45, %v1393_v48  ;;  %v1404_v42 = vadd.f32 %v1582_v49, %v1398_v47 }
 0xe25   :  { %v1405_v44 = vadd.f32 %v1582_v49, %v1399_v50 }
 0xe27   :  { %v1406_v0 = vpack.c.bf16 %v1405_v44, %v1404_v42 }
 0xe29   :  { %1790 = vmatmul.mubr.msk.bf16.vlgmr.msra.gmra.mrb[44].mxu1 %vm118_vm1, %v1406_v0 }
 0xefc   :  { %v1460_v52 = vpop.f32.mrb[44].mxu1 }
 0xefd   :  { %v1461_v40 = vadd.f32 %v1583_v51, %v1460_v52  ;;  %v1791_v53 = vpop.f32.mrb[45].mxu1 }
 0xefe   :  { %v1463_v54 = vpop.f32.mrb[46].mxu1 }
 0xeff   :  { %v1469_v55 = vmul.f32 %v1461_v40, %v1461_v40  ;;  %v1464_v56 = vadd.f32 %v1583_v51, %v1463_v54  ;;  %v1792_v57 = vpop.f32.mrb[47].mxu1  ;;  %v1467_v6 = vmul.f32 0.5, %v1461_v40 }
 0xf01   :  { %v1471_v58 = vmul.f32 %v1469_v55, %v1461_v40  ;;  %v1470_v39 = vmul.f32 %v1464_v56, %v1464_v56  ;;  %v1468_v9 = vmul.f32 0.5, %v1464_v56 }
 0xf03   :  { %v1473_v59 = vmul.f32 0.044715, %v1471_v58  ;;  %v1472_v60 = vmul.f32 %v1470_v39, %v1464_v56 }
 0xf05   :  { %v1475_v61 = vadd.f32 %v1473_v59, %v1461_v40  ;;  %v1474_v62 = vmul.f32 0.044715, %v1472_v60 }
 0xf07   :  { %v1477_v63 = vmul.f32 0.7978846, %v1475_v61  ;;  %v1476_v1 = vadd.f32 %v1474_v62, %v1464_v56 }
 0xf09   :  { %v1478_v2 = vmul.f32 0.7978846, %v1476_v1  ;;  %1851 = vtanh.f32 %v1477_v63 }
 0xf0b   :  { %1853 = vtanh.f32 %v1478_v2 }
 0xf13   :  { %v1852_v3 = vpop.eup %1851 }
 0xf14   :  { %v1481_v7 = vadd.f32 1.0, %v1852_v3 }
 0xf15   :  { %v1854_v29 = vpop.eup %1853 }
 0xf16   :  { %v1483_v8 = vmul.f32 %v1481_v7, %v1467_v6  ;;  %v1482_v10 = vadd.f32 1.0, %v1854_v29 }
 0xf18   :  { %v1485_v11 = vadd.f32 %v1483_v8, %v1404_v42  ;;  %v1484_v12 = vmul.f32 %v1482_v10, %v1468_v9 }
 0xf1a   :  { %v1489_v13 = vsel %vm118_vm1, %v1485_v11, 0.0  ;;  %v1486_v14 = vadd.f32 %v1484_v12, %v1405_v44 }
 0xf1b   :  { %1490 = vadd.xlane.f32.xlu0 %v1489_v13 }
 0xf1c   :  { %v1492_v15 = vsel %vm118_vm1, %v1486_v14, 0.0 }
 0xf1d   :  { %1493 = vadd.xlane.f32.xlu1 %v1492_v15 }
 0xfa8   :  { %v1491_v16 = vpop.xlane.xlu0 %1490 }
 0xfa9   :  { %v1495_v17 = vmul.f32 0.03125, %v1491_v16 }
 0xfaa   :  { %v1494_v18 = vpop.xlane.xlu1 %1493 }
 0xfab   :  { %v1497_v20 = vsub.f32 %v1485_v11, %v1495_v17  ;;  %v1496_v21 = vmul.f32 0.03125, %v1494_v18 }
 0xfad   :  { %v1498_v22 = vsub.f32 %v1486_v14, %v1496_v21  ;;  %v1499_v23 = vmul.f32 %v1497_v20, %v1497_v20 }
 0xfaf   :  { %v1501_v25 = vsel %vm118_vm1, %v1499_v23, 0.0  ;;  %v1500_v26 = vmul.f32 %v1498_v22, %v1498_v22 }
 0xfb0   :  { %1502 = vadd.xlane.f32.xlu0 %v1501_v25 }
 0xfb1   :  { %v1504_v27 = vsel %vm118_vm1, %v1500_v26, 0.0 }
 0xfb2   :  { %1505 = vadd.xlane.f32.xlu1 %v1504_v27 }
0x103d   :  { %v1503_v28 = vpop.xlane.xlu0 %1502 }
0x103e   :  { %v1507_v30 = vmul.f32 0.03125, %v1503_v28 }
0x103f   :  { %v1506_v31 = vpop.xlane.xlu1 %1505 }
0x1040   :  { %v1509_v32 = vadd.f32 1e-05, %v1507_v30  ;;  %v1508_v33 = vmul.f32 0.03125, %v1506_v31 }
0x1042   :  { %1855 = vrsqrt.f32 %v1509_v32  ;;  %v1510_v4 = vadd.f32 1e-05, %v1508_v33 }
0x1044   :  { %1857 = vrsqrt.f32 %v1510_v4 }
0x104c   :  { %v1856_v34 = vpop.eup %1855 }
0x104d   :  { %v1513_v36 = vmul.f32 %v1856_v34, %v1497_v20 }
0x104e   :  { %v1858_v37 = vpop.eup %1857 }
0x104f   :  { %v1514_v41 = vmul.f32 %v1858_v37, %v1498_v22  ;;  %v1519_v19 = vmul.f32 %v1587_v5, %v1513_v36 }
0x1051   :  { %v1520_v43 = vmul.f32 %v1587_v5, %v1514_v41  ;;  %v1525_v24 = vadd.f32 %v1588_v38, %v1519_v19 }
0x1053   :  { %v1526_v45 = vadd.f32 %v1588_v38, %v1520_v43  ;;  %1527 = vst.msk [vmem:[#allocation10] sm:$0xff] %vm118_vm1, %v1525_v24 }
0x1055   :  { %1528 = vst.msk [vmem:[#allocation10 + $0x8] sm:$0xff] %vm118_vm1, %v1526_v45 }
0x1056   :  { %1958 = shalt.err (!%p1955_p8)
}
0x1057   :  { %s1959_s20 = scalar_lea.hbm %s2309_s4, 256 }
0x1058   :  { %p1960_p9 = scmp.ne.s32.totalorder %s2309_s4, %s1959_s20  ;;  %p1963_p10 = scmp.lt.u32.totalorder %s1959_s20, %s2309_s4 }
0x105a   :  { %p1965_p11 = pnand %p1963_p10, %p1960_p9 }
0x105c   :  { %1968 = shalt.err (!%p1965_p11)
}
0x105d   :  { %1540 = dma.vmem_to_hbm [thread:$0]  %s1535_s16, 256, %s2309_s4, [#allocation4], %s1981_s1, %s1981_s1, %s1982_s13  }
0x105e   :  { %1975 = dma.done.wait [#allocation4], 256  }
0x105f   :  { %1976 = vsyncadd [#allocation4], 4294967040 }
0x1060   :  { %1544 = vsyncpa [#allocation3], 1 }
0x1061   :  { %1545 = vsyncpa [#allocation6], 1 }
0x1062   :  { %1546 = vsyncpa [#allocation9], 1 }
0x1063   :  { %1547 = vsyncpa [#allocation4], 1 }

</bundles_post_ra>
